<compile_context>
chip_gen: v7x
topology: tpu7x:2x2x1
jax: 0.10.0
libtpu: 0.0.40
codegen_flags: <defaults>
</compile_context>

<pallas_src>
import functools
import math

import jax
import jax.numpy as jnp
from jax.experimental import pallas as pl
from jax.experimental.pallas import tpu as pltpu


CFG = dict(vocab=100, hidden=32, heads=2, intermediate=64, layers=2,
           max_pos=16, type_vocab=2, num_classes=3)

LANE_PAD = 128  # lane-dense width for the classifier head output


# -------------------------- fused Pallas kernel --------------------------

def _gelu(x):
    # TODO(synk): HF BERT uses exact erf-GELU; tanh approximation used here.
    c = 0.7978845608028654  # sqrt(2/pi)
    return 0.5 * x * (1.0 + jnp.tanh(c * (x + 0.044715 * x * x * x)))


def _layer_norm(x, g, b, eps):
    mu = jnp.mean(x, axis=-1, keepdims=True)
    var = jnp.mean(jnp.square(x - mu), axis=-1, keepdims=True)
    return (x - mu) * jax.lax.rsqrt(var + eps) * g + b


def _bert_fused_kernel(
        emb_ref, mask_ref, emb_g_ref, emb_b_ref,
        wqkv_ref, bqkv_ref, wo_ref, bo_ref, ln1g_ref, ln1b_ref,
        wi_ref, bi_ref, wo2_ref, bo2_ref, ln2g_ref, ln2b_ref,
        poolw_ref, poolb_ref, fcw_ref, fcb_ref,
        out_ref, *, num_layers, num_heads, batch, seq, hidden, ln_eps):
    dh = hidden // num_heads
    scale = 1.0 / math.sqrt(dh)

    mask = mask_ref[...]                                      # [B, S] additive key mask
    h = _layer_norm(emb_ref[...], emb_g_ref[...], emb_b_ref[...], ln_eps)  # [B*S, H] f32

    for l in range(num_layers):                               # static unroll (L=2)
        # Fused QKV projection (bf16 MXU operands, f32 accumulation): [B*S, 3H]
        qkv = (jnp.dot(h.astype(jnp.bfloat16), wqkv_ref[l],
                       preferred_element_type=jnp.float32) + bqkv_ref[l])

        # Attention, unrolled over (batch, head) inside this single kernel call.
        batch_ctx = []
        for b in range(batch):
            rows = slice(b * seq, (b + 1) * seq)
            m_b = mask[b:b + 1, :]                            # [1, S] -> broadcast over queries
            head_ctx = []
            for hd in range(num_heads):
                q = qkv[rows, hd * dh:(hd + 1) * dh]                          # [S, Dh]
                k = qkv[rows, hidden + hd * dh: hidden + (hd + 1) * dh]       # [S, Dh]
                v = qkv[rows, 2 * hidden + hd * dh: 2 * hidden + (hd + 1) * dh]
                s = jnp.dot(q, k.T, preferred_element_type=jnp.float32) * scale + m_b
                s = s - jnp.max(s, axis=-1, keepdims=True)
                p = jnp.exp(s)
                p = p * pl.reciprocal(jnp.sum(p, axis=-1, keepdims=True), approx=True)
                head_ctx.append(jnp.dot(p, v, preferred_element_type=jnp.float32))
            batch_ctx.append(jnp.concatenate(head_ctx, axis=-1))             # [S, H]
        ctx = jnp.concatenate(batch_ctx, axis=0)                              # [B*S, H]

        attn_out = (jnp.dot(ctx.astype(jnp.bfloat16), wo_ref[l],
                            preferred_element_type=jnp.float32) + bo_ref[l])
        # nn.Dropout(0.1) -> identity at inference (eval mode).
        h = _layer_norm(attn_out + h, ln1g_ref[l], ln1b_ref[l], ln_eps)

        inter = _gelu(jnp.dot(h.astype(jnp.bfloat16), wi_ref[l],
                              preferred_element_type=jnp.float32) + bi_ref[l])
        ffn = (jnp.dot(inter.astype(jnp.bfloat16), wo2_ref[l],
                       preferred_element_type=jnp.float32) + bo2_ref[l])
        h = _layer_norm(ffn + h, ln2g_ref[l], ln2b_ref[l], ln_eps)

    # Pooler + classifier computed for ALL rows so the store is a dense
    # [B*S, 128] slab (lane- and sublane-aligned).  The wrapper keeps only the
    # CLS row per sequence and the first num_classes lanes; the redundant rows
    # are negligible compute at these shapes.
    pooled = jnp.tanh(jnp.dot(h.astype(jnp.bfloat16), poolw_ref[...],
                              preferred_element_type=jnp.float32) + poolb_ref[...])
    logits = (jnp.dot(pooled.astype(jnp.bfloat16), fcw_ref[...],
                      preferred_element_type=jnp.float32) + fcb_ref[...])
    out_ref[...] = logits


# -------------------------- parameters --------------------------

def init_params(key, cfg):
    H, I = cfg["hidden"], cfg["intermediate"]

    def nrm(k, shape):
        return 0.02 * jax.random.normal(k, shape, jnp.float32)

    keys = iter(jax.random.split(key, 8 + 12 * cfg["layers"]))
    params = {
        "word_emb": nrm(next(keys), (cfg["vocab"], H)),
        "pos_emb": nrm(next(keys), (cfg["max_pos"], H)),
        "type_emb": nrm(next(keys), (cfg["type_vocab"], H)),
        "emb_ln_g": jnp.ones((H,), jnp.float32),
        "emb_ln_b": jnp.zeros((H,), jnp.float32),
        "pool_w": nrm(next(keys), (H, H)),
        "pool_b": jnp.zeros((H,), jnp.float32),
        "fc_w": nrm(next(keys), (H, cfg["num_classes"])),
        "fc_b": jnp.zeros((cfg["num_classes"],), jnp.float32),
        "layers": [],
    }
    for _ in range(cfg["layers"]):
        params["layers"].append({
            "wq": nrm(next(keys), (H, H)), "bq": jnp.zeros((H,), jnp.float32),
            "wk": nrm(next(keys), (H, H)), "bk": jnp.zeros((H,), jnp.float32),
            "wv": nrm(next(keys), (H, H)), "bv": jnp.zeros((H,), jnp.float32),
            "wo": nrm(next(keys), (H, H)), "bo": jnp.zeros((H,), jnp.float32),
            "ln1_g": jnp.ones((H,), jnp.float32), "ln1_b": jnp.zeros((H,), jnp.float32),
            "wi": nrm(next(keys), (H, I)), "bi": jnp.zeros((I,), jnp.float32),
            "wo2": nrm(next(keys), (I, H)), "bo2": jnp.zeros((H,), jnp.float32),
            "ln2_g": jnp.ones((H,), jnp.float32), "ln2_b": jnp.zeros((H,), jnp.float32),
        })
    return params


def pack_params(params, cfg):
    """Pack per-layer weights into stacked, kernel-friendly tensors.

    Matmul weights go to bf16 (MXU operands); biases / LN params stay f32.
    The classifier head is zero-padded to 128 output lanes.
    """
    H, I, C = cfg["hidden"], cfg["intermediate"], cfg["num_classes"]

    def stack(fn):
        return jnp.stack([fn(lyr) for lyr in params["layers"]], axis=0)

    return dict(
        emb_g=params["emb_ln_g"].reshape(1, H),
        emb_b=params["emb_ln_b"].reshape(1, H),
        wqkv=stack(lambda l: jnp.concatenate([l["wq"], l["wk"], l["wv"]], axis=1)
                   ).astype(jnp.bfloat16),                                   # [L, H, 3H]
        bqkv=stack(lambda l: jnp.concatenate([l["bq"], l["bk"], l["bv"]]).reshape(1, 3 * H)),
        wo=stack(lambda l: l["wo"]).astype(jnp.bfloat16),                    # [L, H, H]
        bo=stack(lambda l: l["bo"].reshape(1, H)),
        ln1g=stack(lambda l: l["ln1_g"].reshape(1, H)),
        ln1b=stack(lambda l: l["ln1_b"].reshape(1, H)),
        wi=stack(lambda l: l["wi"]).astype(jnp.bfloat16),                    # [L, H, I]
        bi=stack(lambda l: l["bi"].reshape(1, I)),
        wo2=stack(lambda l: l["wo2"]).astype(jnp.bfloat16),                  # [L, I, H]
        bo2=stack(lambda l: l["bo2"].reshape(1, H)),
        ln2g=stack(lambda l: l["ln2_g"].reshape(1, H)),
        ln2b=stack(lambda l: l["ln2_b"].reshape(1, H)),
        pool_w=params["pool_w"].astype(jnp.bfloat16),
        pool_b=params["pool_b"].reshape(1, H),
        fc_w=jnp.zeros((H, LANE_PAD), jnp.float32).at[:, :C].set(params["fc_w"])
             .astype(jnp.bfloat16),
        fc_b=jnp.zeros((1, LANE_PAD), jnp.float32).at[0, :C].set(params["fc_b"]),
    )


# -------------------------- forward pass --------------------------

def bert_classifier_forward(params, input_ids, attention_mask, cfg):
    B, S = input_ids.shape
    H = cfg["hidden"]

    # Embedding table lookups (gathers) stay in XLA; everything else is one
    # fused Pallas kernel with weights resident in VMEM.
    # TODO(synk): token_type_ids assumed all-zero (matches the reference usage).
    emb = (params["word_emb"][input_ids]
           + params["pos_emb"][jnp.arange(S)][None, :, :]
           + params["type_emb"][0][None, None, :]).reshape(B * S, H)

    # BERT extended attention mask: (1 - mask) * -10000, added to attention logits.
    mask_add = (1.0 - attention_mask.astype(jnp.float32)) * -10000.0          # [B, S]

    p = pack_params(params, cfg)
    inputs = (emb, mask_add, p["emb_g"], p["emb_b"],
              p["wqkv"], p["bqkv"], p["wo"], p["bo"], p["ln1g"], p["ln1b"],
              p["wi"], p["bi"], p["wo2"], p["bo2"], p["ln2g"], p["ln2b"],
              p["pool_w"], p["pool_b"], p["fc_w"], p["fc_b"])

    kernel = functools.partial(
        _bert_fused_kernel, num_layers=cfg["layers"], num_heads=cfg["heads"],
        batch=B, seq=S, hidden=H, ln_eps=1e-12)

    vmem_spec = pl.BlockSpec(memory_space=pltpu.MemorySpace.VMEM)
    logits_pad = pl.pallas_call(
        kernel,
        out_shape=jax.ShapeDtypeStruct((B * S, LANE_PAD), jnp.float32),
        in_specs=[vmem_spec] * len(inputs),
        out_specs=vmem_spec,
    )(*inputs)

    # Keep the CLS (first) row of each sequence and the real logit lanes.
    return logits_pad.reshape(B, S, LANE_PAD)[:, 0, :cfg["num_classes"]]


# -------------------------- driver --------------------------

if __name__ == "__main__":
    key = jax.random.PRNGKey(0)
    k_param, k_ids = jax.random.split(key)

    B, S = 2, 8
    params = init_params(k_param, CFG)
    input_ids = jax.random.randint(k_ids, (B, S), 0, CFG["vocab"], dtype=jnp.int32)
    attention_mask = jnp.array([[1, 1, 1, 1, 1, 1, 1, 1],
                                [1, 1, 1, 1, 1, 1, 0, 0]], dtype=jnp.int32)

    logits = bert_classifier_forward(params, input_ids, attention_mask, CFG)
    logits = jax.block_until_ready(logits)
    assert logits.shape == (B, CFG["num_classes"])
    assert bool(jnp.all(jnp.isfinite(logits)))
    print("KERNEL_OK")
</pallas_src>

<mosaic_0001>
module attributes {stable_mosaic.version = 11 : i64} {
  func.func @_bert_fused_kernel(%arg0: memref<16x32xf32, #tpu.memory_space<vmem>>, %arg1: memref<2x8xf32, #tpu.memory_space<vmem>>, %arg2: memref<1x32xf32, #tpu.memory_space<vmem>>, %arg3: memref<1x32xf32, #tpu.memory_space<vmem>>, %arg4: memref<2x32x96xbf16, #tpu.memory_space<vmem>>, %arg5: memref<2x1x96xf32, #tpu.memory_space<vmem>>, %arg6: memref<2x32x32xbf16, #tpu.memory_space<vmem>>, %arg7: memref<2x1x32xf32, #tpu.memory_space<vmem>>, %arg8: memref<2x1x32xf32, #tpu.memory_space<vmem>>, %arg9: memref<2x1x32xf32, #tpu.memory_space<vmem>>, %arg10: memref<2x32x64xbf16, #tpu.memory_space<vmem>>, %arg11: memref<2x1x64xf32, #tpu.memory_space<vmem>>, %arg12: memref<2x64x32xbf16, #tpu.memory_space<vmem>>, %arg13: memref<2x1x32xf32, #tpu.memory_space<vmem>>, %arg14: memref<2x1x32xf32, #tpu.memory_space<vmem>>, %arg15: memref<2x1x32xf32, #tpu.memory_space<vmem>>, %arg16: memref<32x32xbf16, #tpu.memory_space<vmem>>, %arg17: memref<1x32xf32, #tpu.memory_space<vmem>>, %arg18: memref<32x128xbf16, #tpu.memory_space<vmem>>, %arg19: memref<1x128xf32, #tpu.memory_space<vmem>>, %arg20: memref<16x128xf32, #tpu.memory_space<vmem>>) attributes {dimension_semantics = [], scalar_prefetch = 0 : i64, scratch_operands = 0 : i64, tpu.core_type = #tpu.core_type<tc>} {
    %c0 = arith.constant 0 : index
    %c0_0 = arith.constant 0 : index
    %0 = vector.load %arg1[%c0, %c0_0] : memref<2x8xf32, #tpu.memory_space<vmem>>, vector<2x8xf32>
    %c0_1 = arith.constant 0 : index
    %c0_2 = arith.constant 0 : index
    %1 = vector.load %arg0[%c0_1, %c0_2] : memref<16x32xf32, #tpu.memory_space<vmem>>, vector<16x32xf32>
    %c0_3 = arith.constant 0 : index
    %c0_4 = arith.constant 0 : index
    %2 = vector.load %arg2[%c0_3, %c0_4] : memref<1x32xf32, #tpu.memory_space<vmem>>, vector<1x32xf32>
    %c0_5 = arith.constant 0 : index
    %c0_6 = arith.constant 0 : index
    %3 = vector.load %arg3[%c0_5, %c0_6] : memref<1x32xf32, #tpu.memory_space<vmem>>, vector<1x32xf32>
    %cst = arith.constant dense<0.000000e+00> : vector<16xf32>
    %4 = vector.multi_reduction <add>, %1, %cst [1] : vector<16x32xf32> to vector<16xf32>
    %5 = vector.shape_cast %4 : vector<16xf32> to vector<16x1xf32>
    %cst_7 = arith.constant 3.200000e+01 : f32
    %6 = vector.broadcast %cst_7 : f32 to vector<16x1xf32>
    %7 = arith.divf %5, %6 : vector<16x1xf32>
    %8 = vector.broadcast %7 : vector<16x1xf32> to vector<16x32xf32>
    %9 = arith.subf %1, %8 : vector<16x32xf32>
    %10 = arith.mulf %9, %9 : vector<16x32xf32>
    %cst_8 = arith.constant dense<0.000000e+00> : vector<16xf32>
    %11 = vector.multi_reduction <add>, %10, %cst_8 [1] : vector<16x32xf32> to vector<16xf32>
    %12 = vector.shape_cast %11 : vector<16xf32> to vector<16x1xf32>
    %cst_9 = arith.constant 3.200000e+01 : f32
    %13 = vector.broadcast %cst_9 : f32 to vector<16x1xf32>
    %14 = arith.divf %12, %13 : vector<16x1xf32>
    %15 = vector.broadcast %7 : vector<16x1xf32> to vector<16x32xf32>
    %16 = arith.subf %1, %15 : vector<16x32xf32>
    %cst_10 = arith.constant 9.99999996E-13 : f32
    %17 = vector.broadcast %cst_10 : f32 to vector<16x1xf32>
    %18 = arith.addf %14, %17 : vector<16x1xf32>
    %19 = math.rsqrt %18 : vector<16x1xf32>
    %20 = vector.broadcast %19 : vector<16x1xf32> to vector<16x32xf32>
    %21 = arith.mulf %16, %20 : vector<16x32xf32>
    %22 = vector.broadcast %2 : vector<1x32xf32> to vector<16x32xf32>
    %23 = arith.mulf %21, %22 : vector<16x32xf32>
    %24 = vector.broadcast %3 : vector<1x32xf32> to vector<16x32xf32>
    %25 = arith.addf %23, %24 : vector<16x32xf32>
    %26 = arith.truncf %25 : vector<16x32xf32> to vector<16x32xbf16>
    %c0_11 = arith.constant 0 : index
    %c0_12 = arith.constant 0 : index
    %c0_13 = arith.constant 0 : index
    %27 = vector.load %arg4[%c0_11, %c0_12, %c0_13] : memref<2x32x96xbf16, #tpu.memory_space<vmem>>, vector<1x32x96xbf16>
    %28 = vector.shape_cast %27 : vector<1x32x96xbf16> to vector<32x96xbf16>
    %cst_14 = arith.constant dense<0.000000e+00> : vector<16x96xf32>
    %29 = tpu.matmul %26, %28, %cst_14 {dimension_numbers = #tpu.dot_dimension_numbers<[1], [0], [0], [1], [0, 0, 1, 1], [], []>} : vector<16x32xbf16>, vector<32x96xbf16>, vector<16x96xf32> -> vector<16x96xf32>
    %c0_15 = arith.constant 0 : index
    %c0_16 = arith.constant 0 : index
    %c0_17 = arith.constant 0 : index
    %30 = vector.load %arg5[%c0_15, %c0_16, %c0_17] : memref<2x1x96xf32, #tpu.memory_space<vmem>>, vector<1x1x96xf32>
    %31 = vector.shape_cast %30 : vector<1x1x96xf32> to vector<1x96xf32>
    %32 = vector.broadcast %31 : vector<1x96xf32> to vector<16x96xf32>
    %33 = arith.addf %29, %32 : vector<16x96xf32>
    %34 = vector.extract_strided_slice %0 {offsets = [0, 0], sizes = [1, 8], strides = [1, 1]} : vector<2x8xf32> to vector<1x8xf32>
    %35 = vector.extract_strided_slice %33 {offsets = [0, 0], sizes = [8, 16], strides = [1, 1]} : vector<16x96xf32> to vector<8x16xf32>
    %36 = vector.extract_strided_slice %33 {offsets = [0, 32], sizes = [8, 16], strides = [1, 1]} : vector<16x96xf32> to vector<8x16xf32>
    %37 = vector.extract_strided_slice %33 {offsets = [0, 64], sizes = [8, 16], strides = [1, 1]} : vector<16x96xf32> to vector<8x16xf32>
    %38 = tpu.transpose %36, [1, 0] : vector<8x16xf32> -> vector<16x8xf32>
    %cst_18 = arith.constant dense<0.000000e+00> : vector<8x8xf32>
    %39 = tpu.matmul %35, %38, %cst_18 {dimension_numbers = #tpu.dot_dimension_numbers<[1], [0], [0], [1], [0, 0, 1, 1], [], []>} : vector<8x16xf32>, vector<16x8xf32>, vector<8x8xf32> -> vector<8x8xf32>
    %cst_19 = arith.constant 2.500000e-01 : f32
    %40 = vector.broadcast %cst_19 : f32 to vector<8x8xf32>
    %41 = arith.mulf %39, %40 : vector<8x8xf32>
    %42 = vector.broadcast %34 : vector<1x8xf32> to vector<8x8xf32>
    %43 = arith.addf %41, %42 : vector<8x8xf32>
    %cst_20 = arith.constant dense<0xFF800000> : vector<8xf32>
    %44 = vector.multi_reduction <maximumf>, %43, %cst_20 [1] : vector<8x8xf32> to vector<8xf32>
    %45 = vector.shape_cast %44 : vector<8xf32> to vector<8x1xf32>
    %46 = vector.broadcast %45 : vector<8x1xf32> to vector<8x8xf32>
    %47 = arith.subf %43, %46 : vector<8x8xf32>
    %48 = math.exp %47 : vector<8x8xf32>
    %cst_21 = arith.constant dense<0.000000e+00> : vector<8xf32>
    %49 = vector.multi_reduction <add>, %48, %cst_21 [1] : vector<8x8xf32> to vector<8xf32>
    %50 = vector.shape_cast %49 : vector<8xf32> to vector<8x1xf32>
    %51 = tpu.reciprocal %50 {approx = true} : vector<8x1xf32> -> vector<8x1xf32>
    %52 = vector.broadcast %51 : vector<8x1xf32> to vector<8x8xf32>
    %53 = arith.mulf %48, %52 : vector<8x8xf32>
    %cst_22 = arith.constant dense<0.000000e+00> : vector<8x16xf32>
    %54 = tpu.matmul %53, %37, %cst_22 {dimension_numbers = #tpu.dot_dimension_numbers<[1], [0], [0], [1], [0, 0, 1, 1], [], []>} : vector<8x8xf32>, vector<8x16xf32>, vector<8x16xf32> -> vector<8x16xf32>
    %55 = vector.extract_strided_slice %33 {offsets = [0, 16], sizes = [8, 16], strides = [1, 1]} : vector<16x96xf32> to vector<8x16xf32>
    %56 = vector.extract_strided_slice %33 {offsets = [0, 48], sizes = [8, 16], strides = [1, 1]} : vector<16x96xf32> to vector<8x16xf32>
    %57 = vector.extract_strided_slice %33 {offsets = [0, 80], sizes = [8, 16], strides = [1, 1]} : vector<16x96xf32> to vector<8x16xf32>
    %58 = tpu.transpose %56, [1, 0] : vector<8x16xf32> -> vector<16x8xf32>
    %cst_23 = arith.constant dense<0.000000e+00> : vector<8x8xf32>
    %59 = tpu.matmul %55, %58, %cst_23 {dimension_numbers = #tpu.dot_dimension_numbers<[1], [0], [0], [1], [0, 0, 1, 1], [], []>} : vector<8x16xf32>, vector<16x8xf32>, vector<8x8xf32> -> vector<8x8xf32>
    %cst_24 = arith.constant 2.500000e-01 : f32
    %60 = vector.broadcast %cst_24 : f32 to vector<8x8xf32>
    %61 = arith.mulf %59, %60 : vector<8x8xf32>
    %62 = vector.broadcast %34 : vector<1x8xf32> to vector<8x8xf32>
    %63 = arith.addf %61, %62 : vector<8x8xf32>
    %cst_25 = arith.constant dense<0xFF800000> : vector<8xf32>
    %64 = vector.multi_reduction <maximumf>, %63, %cst_25 [1] : vector<8x8xf32> to vector<8xf32>
    %65 = vector.shape_cast %64 : vector<8xf32> to vector<8x1xf32>
    %66 = vector.broadcast %65 : vector<8x1xf32> to vector<8x8xf32>
    %67 = arith.subf %63, %66 : vector<8x8xf32>
    %68 = math.exp %67 : vector<8x8xf32>
    %cst_26 = arith.constant dense<0.000000e+00> : vector<8xf32>
    %69 = vector.multi_reduction <add>, %68, %cst_26 [1] : vector<8x8xf32> to vector<8xf32>
    %70 = vector.shape_cast %69 : vector<8xf32> to vector<8x1xf32>
    %71 = tpu.reciprocal %70 {approx = true} : vector<8x1xf32> -> vector<8x1xf32>
    %72 = vector.broadcast %71 : vector<8x1xf32> to vector<8x8xf32>
    %73 = arith.mulf %68, %72 : vector<8x8xf32>
    %cst_27 = arith.constant dense<0.000000e+00> : vector<8x16xf32>
    %74 = tpu.matmul %73, %57, %cst_27 {dimension_numbers = #tpu.dot_dimension_numbers<[1], [0], [0], [1], [0, 0, 1, 1], [], []>} : vector<8x8xf32>, vector<8x16xf32>, vector<8x16xf32> -> vector<8x16xf32>
    %75 = tpu.concatenate %54, %74 in 1 : vector<8x16xf32>, vector<8x16xf32> -> vector<8x32xf32>
    %76 = vector.extract_strided_slice %0 {offsets = [1, 0], sizes = [1, 8], strides = [1, 1]} : vector<2x8xf32> to vector<1x8xf32>
    %77 = vector.extract_strided_slice %33 {offsets = [8, 0], sizes = [8, 16], strides = [1, 1]} : vector<16x96xf32> to vector<8x16xf32>
    %78 = vector.extract_strided_slice %33 {offsets = [8, 32], sizes = [8, 16], strides = [1, 1]} : vector<16x96xf32> to vector<8x16xf32>
    %79 = vector.extract_strided_slice %33 {offsets = [8, 64], sizes = [8, 16], strides = [1, 1]} : vector<16x96xf32> to vector<8x16xf32>
    %80 = tpu.transpose %78, [1, 0] : vector<8x16xf32> -> vector<16x8xf32>
    %cst_28 = arith.constant dense<0.000000e+00> : vector<8x8xf32>
    %81 = tpu.matmul %77, %80, %cst_28 {dimension_numbers = #tpu.dot_dimension_numbers<[1], [0], [0], [1], [0, 0, 1, 1], [], []>} : vector<8x16xf32>, vector<16x8xf32>, vector<8x8xf32> -> vector<8x8xf32>
    %cst_29 = arith.constant 2.500000e-01 : f32
    %82 = vector.broadcast %cst_29 : f32 to vector<8x8xf32>
    %83 = arith.mulf %81, %82 : vector<8x8xf32>
    %84 = vector.broadcast %76 : vector<1x8xf32> to vector<8x8xf32>
    %85 = arith.addf %83, %84 : vector<8x8xf32>
    %cst_30 = arith.constant dense<0xFF800000> : vector<8xf32>
    %86 = vector.multi_reduction <maximumf>, %85, %cst_30 [1] : vector<8x8xf32> to vector<8xf32>
    %87 = vector.shape_cast %86 : vector<8xf32> to vector<8x1xf32>
    %88 = vector.broadcast %87 : vector<8x1xf32> to vector<8x8xf32>
    %89 = arith.subf %85, %88 : vector<8x8xf32>
    %90 = math.exp %89 : vector<8x8xf32>
    %cst_31 = arith.constant dense<0.000000e+00> : vector<8xf32>
    %91 = vector.multi_reduction <add>, %90, %cst_31 [1] : vector<8x8xf32> to vector<8xf32>
    %92 = vector.shape_cast %91 : vector<8xf32> to vector<8x1xf32>
    %93 = tpu.reciprocal %92 {approx = true} : vector<8x1xf32> -> vector<8x1xf32>
    %94 = vector.broadcast %93 : vector<8x1xf32> to vector<8x8xf32>
    %95 = arith.mulf %90, %94 : vector<8x8xf32>
    %cst_32 = arith.constant dense<0.000000e+00> : vector<8x16xf32>
    %96 = tpu.matmul %95, %79, %cst_32 {dimension_numbers = #tpu.dot_dimension_numbers<[1], [0], [0], [1], [0, 0, 1, 1], [], []>} : vector<8x8xf32>, vector<8x16xf32>, vector<8x16xf32> -> vector<8x16xf32>
    %97 = vector.extract_strided_slice %33 {offsets = [8, 16], sizes = [8, 16], strides = [1, 1]} : vector<16x96xf32> to vector<8x16xf32>
    %98 = vector.extract_strided_slice %33 {offsets = [8, 48], sizes = [8, 16], strides = [1, 1]} : vector<16x96xf32> to vector<8x16xf32>
    %99 = vector.extract_strided_slice %33 {offsets = [8, 80], sizes = [8, 16], strides = [1, 1]} : vector<16x96xf32> to vector<8x16xf32>
    %100 = tpu.transpose %98, [1, 0] : vector<8x16xf32> -> vector<16x8xf32>
    %cst_33 = arith.constant dense<0.000000e+00> : vector<8x8xf32>
    %101 = tpu.matmul %97, %100, %cst_33 {dimension_numbers = #tpu.dot_dimension_numbers<[1], [0], [0], [1], [0, 0, 1, 1], [], []>} : vector<8x16xf32>, vector<16x8xf32>, vector<8x8xf32> -> vector<8x8xf32>
    %cst_34 = arith.constant 2.500000e-01 : f32
    %102 = vector.broadcast %cst_34 : f32 to vector<8x8xf32>
    %103 = arith.mulf %101, %102 : vector<8x8xf32>
    %104 = vector.broadcast %76 : vector<1x8xf32> to vector<8x8xf32>
    %105 = arith.addf %103, %104 : vector<8x8xf32>
    %cst_35 = arith.constant dense<0xFF800000> : vector<8xf32>
    %106 = vector.multi_reduction <maximumf>, %105, %cst_35 [1] : vector<8x8xf32> to vector<8xf32>
    %107 = vector.shape_cast %106 : vector<8xf32> to vector<8x1xf32>
    %108 = vector.broadcast %107 : vector<8x1xf32> to vector<8x8xf32>
    %109 = arith.subf %105, %108 : vector<8x8xf32>
    %110 = math.exp %109 : vector<8x8xf32>
    %cst_36 = arith.constant dense<0.000000e+00> : vector<8xf32>
    %111 = vector.multi_reduction <add>, %110, %cst_36 [1] : vector<8x8xf32> to vector<8xf32>
    %112 = vector.shape_cast %111 : vector<8xf32> to vector<8x1xf32>
    %113 = tpu.reciprocal %112 {approx = true} : vector<8x1xf32> -> vector<8x1xf32>
    %114 = vector.broadcast %113 : vector<8x1xf32> to vector<8x8xf32>
    %115 = arith.mulf %110, %114 : vector<8x8xf32>
    %cst_37 = arith.constant dense<0.000000e+00> : vector<8x16xf32>
    %116 = tpu.matmul %115, %99, %cst_37 {dimension_numbers = #tpu.dot_dimension_numbers<[1], [0], [0], [1], [0, 0, 1, 1], [], []>} : vector<8x8xf32>, vector<8x16xf32>, vector<8x16xf32> -> vector<8x16xf32>
    %117 = tpu.concatenate %96, %116 in 1 : vector<8x16xf32>, vector<8x16xf32> -> vector<8x32xf32>
    %118 = tpu.concatenate %75, %117 in 0 : vector<8x32xf32>, vector<8x32xf32> -> vector<16x32xf32>
    %119 = arith.truncf %118 : vector<16x32xf32> to vector<16x32xbf16>
    %c0_38 = arith.constant 0 : index
    %c0_39 = arith.constant 0 : index
    %c0_40 = arith.constant 0 : index
    %120 = vector.load %arg6[%c0_38, %c0_39, %c0_40] : memref<2x32x32xbf16, #tpu.memory_space<vmem>>, vector<1x32x32xbf16>
    %121 = vector.shape_cast %120 : vector<1x32x32xbf16> to vector<32x32xbf16>
    %cst_41 = arith.constant dense<0.000000e+00> : vector<16x32xf32>
    %122 = tpu.matmul %119, %121, %cst_41 {dimension_numbers = #tpu.dot_dimension_numbers<[1], [0], [0], [1], [0, 0, 1, 1], [], []>} : vector<16x32xbf16>, vector<32x32xbf16>, vector<16x32xf32> -> vector<16x32xf32>
    %c0_42 = arith.constant 0 : index
    %c0_43 = arith.constant 0 : index
    %c0_44 = arith.constant 0 : index
    %123 = vector.load %arg7[%c0_42, %c0_43, %c0_44] : memref<2x1x32xf32, #tpu.memory_space<vmem>>, vector<1x1x32xf32>
    %124 = vector.shape_cast %123 : vector<1x1x32xf32> to vector<1x32xf32>
    %125 = vector.broadcast %124 : vector<1x32xf32> to vector<16x32xf32>
    %126 = arith.addf %122, %125 : vector<16x32xf32>
    %127 = arith.addf %126, %25 : vector<16x32xf32>
    %c0_45 = arith.constant 0 : index
    %c0_46 = arith.constant 0 : index
    %c0_47 = arith.constant 0 : index
    %128 = vector.load %arg8[%c0_45, %c0_46, %c0_47] : memref<2x1x32xf32, #tpu.memory_space<vmem>>, vector<1x1x32xf32>
    %129 = vector.shape_cast %128 : vector<1x1x32xf32> to vector<1x32xf32>
    %c0_48 = arith.constant 0 : index
    %c0_49 = arith.constant 0 : index
    %c0_50 = arith.constant 0 : index
    %130 = vector.load %arg9[%c0_48, %c0_49, %c0_50] : memref<2x1x32xf32, #tpu.memory_space<vmem>>, vector<1x1x32xf32>
    %131 = vector.shape_cast %130 : vector<1x1x32xf32> to vector<1x32xf32>
    %cst_51 = arith.constant dense<0.000000e+00> : vector<16xf32>
    %132 = vector.multi_reduction <add>, %127, %cst_51 [1] : vector<16x32xf32> to vector<16xf32>
    %133 = vector.shape_cast %132 : vector<16xf32> to vector<16x1xf32>
    %cst_52 = arith.constant 3.200000e+01 : f32
    %134 = vector.broadcast %cst_52 : f32 to vector<16x1xf32>
    %135 = arith.divf %133, %134 : vector<16x1xf32>
    %136 = vector.broadcast %135 : vector<16x1xf32> to vector<16x32xf32>
    %137 = arith.subf %127, %136 : vector<16x32xf32>
    %138 = arith.mulf %137, %137 : vector<16x32xf32>
    %cst_53 = arith.constant dense<0.000000e+00> : vector<16xf32>
    %139 = vector.multi_reduction <add>, %138, %cst_53 [1] : vector<16x32xf32> to vector<16xf32>
    %140 = vector.shape_cast %139 : vector<16xf32> to vector<16x1xf32>
    %cst_54 = arith.constant 3.200000e+01 : f32
    %141 = vector.broadcast %cst_54 : f32 to vector<16x1xf32>
    %142 = arith.divf %140, %141 : vector<16x1xf32>
    %143 = vector.broadcast %135 : vector<16x1xf32> to vector<16x32xf32>
    %144 = arith.subf %127, %143 : vector<16x32xf32>
    %cst_55 = arith.constant 9.99999996E-13 : f32
    %145 = vector.broadcast %cst_55 : f32 to vector<16x1xf32>
    %146 = arith.addf %142, %145 : vector<16x1xf32>
    %147 = math.rsqrt %146 : vector<16x1xf32>
    %148 = vector.broadcast %147 : vector<16x1xf32> to vector<16x32xf32>
    %149 = arith.mulf %144, %148 : vector<16x32xf32>
    %150 = vector.broadcast %129 : vector<1x32xf32> to vector<16x32xf32>
    %151 = arith.mulf %149, %150 : vector<16x32xf32>
    %152 = vector.broadcast %131 : vector<1x32xf32> to vector<16x32xf32>
    %153 = arith.addf %151, %152 : vector<16x32xf32>
    %154 = arith.truncf %153 : vector<16x32xf32> to vector<16x32xbf16>
    %c0_56 = arith.constant 0 : index
    %c0_57 = arith.constant 0 : index
    %c0_58 = arith.constant 0 : index
    %155 = vector.load %arg10[%c0_56, %c0_57, %c0_58] : memref<2x32x64xbf16, #tpu.memory_space<vmem>>, vector<1x32x64xbf16>
    %156 = vector.shape_cast %155 : vector<1x32x64xbf16> to vector<32x64xbf16>
    %cst_59 = arith.constant dense<0.000000e+00> : vector<16x64xf32>
    %157 = tpu.matmul %154, %156, %cst_59 {dimension_numbers = #tpu.dot_dimension_numbers<[1], [0], [0], [1], [0, 0, 1, 1], [], []>} : vector<16x32xbf16>, vector<32x64xbf16>, vector<16x64xf32> -> vector<16x64xf32>
    %c0_60 = arith.constant 0 : index
    %c0_61 = arith.constant 0 : index
    %c0_62 = arith.constant 0 : index
    %158 = vector.load %arg11[%c0_60, %c0_61, %c0_62] : memref<2x1x64xf32, #tpu.memory_space<vmem>>, vector<1x1x64xf32>
    %159 = vector.shape_cast %158 : vector<1x1x64xf32> to vector<1x64xf32>
    %160 = vector.broadcast %159 : vector<1x64xf32> to vector<16x64xf32>
    %161 = arith.addf %157, %160 : vector<16x64xf32>
    %cst_63 = arith.constant 5.000000e-01 : f32
    %162 = vector.broadcast %cst_63 : f32 to vector<16x64xf32>
    %163 = arith.mulf %162, %161 : vector<16x64xf32>
    %cst_64 = arith.constant 4.471500e-02 : f32
    %164 = vector.broadcast %cst_64 : f32 to vector<16x64xf32>
    %165 = arith.mulf %164, %161 : vector<16x64xf32>
    %166 = arith.mulf %165, %161 : vector<16x64xf32>
    %167 = arith.mulf %166, %161 : vector<16x64xf32>
    %168 = arith.addf %161, %167 : vector<16x64xf32>
    %cst_65 = arith.constant 0.797884583 : f32
    %169 = vector.broadcast %cst_65 : f32 to vector<16x64xf32>
    %170 = arith.mulf %169, %168 : vector<16x64xf32>
    %171 = math.tanh %170 : vector<16x64xf32>
    %cst_66 = arith.constant 1.000000e+00 : f32
    %172 = vector.broadcast %cst_66 : f32 to vector<16x64xf32>
    %173 = arith.addf %172, %171 : vector<16x64xf32>
    %174 = arith.mulf %163, %173 : vector<16x64xf32>
    %175 = arith.truncf %174 : vector<16x64xf32> to vector<16x64xbf16>
    %c0_67 = arith.constant 0 : index
    %c0_68 = arith.constant 0 : index
    %c0_69 = arith.constant 0 : index
    %176 = vector.load %arg12[%c0_67, %c0_68, %c0_69] : memref<2x64x32xbf16, #tpu.memory_space<vmem>>, vector<1x64x32xbf16>
    %177 = vector.shape_cast %176 : vector<1x64x32xbf16> to vector<64x32xbf16>
    %cst_70 = arith.constant dense<0.000000e+00> : vector<16x32xf32>
    %178 = tpu.matmul %175, %177, %cst_70 {dimension_numbers = #tpu.dot_dimension_numbers<[1], [0], [0], [1], [0, 0, 1, 1], [], []>} : vector<16x64xbf16>, vector<64x32xbf16>, vector<16x32xf32> -> vector<16x32xf32>
    %c0_71 = arith.constant 0 : index
    %c0_72 = arith.constant 0 : index
    %c0_73 = arith.constant 0 : index
    %179 = vector.load %arg13[%c0_71, %c0_72, %c0_73] : memref<2x1x32xf32, #tpu.memory_space<vmem>>, vector<1x1x32xf32>
    %180 = vector.shape_cast %179 : vector<1x1x32xf32> to vector<1x32xf32>
    %181 = vector.broadcast %180 : vector<1x32xf32> to vector<16x32xf32>
    %182 = arith.addf %178, %181 : vector<16x32xf32>
    %183 = arith.addf %182, %153 : vector<16x32xf32>
    %c0_74 = arith.constant 0 : index
    %c0_75 = arith.constant 0 : index
    %c0_76 = arith.constant 0 : index
    %184 = vector.load %arg14[%c0_74, %c0_75, %c0_76] : memref<2x1x32xf32, #tpu.memory_space<vmem>>, vector<1x1x32xf32>
    %185 = vector.shape_cast %184 : vector<1x1x32xf32> to vector<1x32xf32>
    %c0_77 = arith.constant 0 : index
    %c0_78 = arith.constant 0 : index
    %c0_79 = arith.constant 0 : index
    %186 = vector.load %arg15[%c0_77, %c0_78, %c0_79] : memref<2x1x32xf32, #tpu.memory_space<vmem>>, vector<1x1x32xf32>
    %187 = vector.shape_cast %186 : vector<1x1x32xf32> to vector<1x32xf32>
    %cst_80 = arith.constant dense<0.000000e+00> : vector<16xf32>
    %188 = vector.multi_reduction <add>, %183, %cst_80 [1] : vector<16x32xf32> to vector<16xf32>
    %189 = vector.shape_cast %188 : vector<16xf32> to vector<16x1xf32>
    %cst_81 = arith.constant 3.200000e+01 : f32
    %190 = vector.broadcast %cst_81 : f32 to vector<16x1xf32>
    %191 = arith.divf %189, %190 : vector<16x1xf32>
    %192 = vector.broadcast %191 : vector<16x1xf32> to vector<16x32xf32>
    %193 = arith.subf %183, %192 : vector<16x32xf32>
    %194 = arith.mulf %193, %193 : vector<16x32xf32>
    %cst_82 = arith.constant dense<0.000000e+00> : vector<16xf32>
    %195 = vector.multi_reduction <add>, %194, %cst_82 [1] : vector<16x32xf32> to vector<16xf32>
    %196 = vector.shape_cast %195 : vector<16xf32> to vector<16x1xf32>
    %cst_83 = arith.constant 3.200000e+01 : f32
    %197 = vector.broadcast %cst_83 : f32 to vector<16x1xf32>
    %198 = arith.divf %196, %197 : vector<16x1xf32>
    %199 = vector.broadcast %191 : vector<16x1xf32> to vector<16x32xf32>
    %200 = arith.subf %183, %199 : vector<16x32xf32>
    %cst_84 = arith.constant 9.99999996E-13 : f32
    %201 = vector.broadcast %cst_84 : f32 to vector<16x1xf32>
    %202 = arith.addf %198, %201 : vector<16x1xf32>
    %203 = math.rsqrt %202 : vector<16x1xf32>
    %204 = vector.broadcast %203 : vector<16x1xf32> to vector<16x32xf32>
    %205 = arith.mulf %200, %204 : vector<16x32xf32>
    %206 = vector.broadcast %185 : vector<1x32xf32> to vector<16x32xf32>
    %207 = arith.mulf %205, %206 : vector<16x32xf32>
    %208 = vector.broadcast %187 : vector<1x32xf32> to vector<16x32xf32>
    %209 = arith.addf %207, %208 : vector<16x32xf32>
    %210 = arith.truncf %209 : vector<16x32xf32> to vector<16x32xbf16>
    %c1 = arith.constant 1 : index
    %c0_85 = arith.constant 0 : index
    %c0_86 = arith.constant 0 : index
    %211 = vector.load %arg4[%c1, %c0_85, %c0_86] : memref<2x32x96xbf16, #tpu.memory_space<vmem>>, vector<1x32x96xbf16>
    %212 = vector.shape_cast %211 : vector<1x32x96xbf16> to vector<32x96xbf16>
    %cst_87 = arith.constant dense<0.000000e+00> : vector<16x96xf32>
    %213 = tpu.matmul %210, %212, %cst_87 {dimension_numbers = #tpu.dot_dimension_numbers<[1], [0], [0], [1], [0, 0, 1, 1], [], []>} : vector<16x32xbf16>, vector<32x96xbf16>, vector<16x96xf32> -> vector<16x96xf32>
    %c1_88 = arith.constant 1 : index
    %c0_89 = arith.constant 0 : index
    %c0_90 = arith.constant 0 : index
    %214 = vector.load %arg5[%c1_88, %c0_89, %c0_90] : memref<2x1x96xf32, #tpu.memory_space<vmem>>, vector<1x1x96xf32>
    %215 = vector.shape_cast %214 : vector<1x1x96xf32> to vector<1x96xf32>
    %216 = vector.broadcast %215 : vector<1x96xf32> to vector<16x96xf32>
    %217 = arith.addf %213, %216 : vector<16x96xf32>
    %218 = vector.extract_strided_slice %0 {offsets = [0, 0], sizes = [1, 8], strides = [1, 1]} : vector<2x8xf32> to vector<1x8xf32>
    %219 = vector.extract_strided_slice %217 {offsets = [0, 0], sizes = [8, 16], strides = [1, 1]} : vector<16x96xf32> to vector<8x16xf32>
    %220 = vector.extract_strided_slice %217 {offsets = [0, 32], sizes = [8, 16], strides = [1, 1]} : vector<16x96xf32> to vector<8x16xf32>
    %221 = vector.extract_strided_slice %217 {offsets = [0, 64], sizes = [8, 16], strides = [1, 1]} : vector<16x96xf32> to vector<8x16xf32>
    %222 = tpu.transpose %220, [1, 0] : vector<8x16xf32> -> vector<16x8xf32>
    %cst_91 = arith.constant dense<0.000000e+00> : vector<8x8xf32>
    %223 = tpu.matmul %219, %222, %cst_91 {dimension_numbers = #tpu.dot_dimension_numbers<[1], [0], [0], [1], [0, 0, 1, 1], [], []>} : vector<8x16xf32>, vector<16x8xf32>, vector<8x8xf32> -> vector<8x8xf32>
    %cst_92 = arith.constant 2.500000e-01 : f32
    %224 = vector.broadcast %cst_92 : f32 to vector<8x8xf32>
    %225 = arith.mulf %223, %224 : vector<8x8xf32>
    %226 = vector.broadcast %218 : vector<1x8xf32> to vector<8x8xf32>
    %227 = arith.addf %225, %226 : vector<8x8xf32>
    %cst_93 = arith.constant dense<0xFF800000> : vector<8xf32>
    %228 = vector.multi_reduction <maximumf>, %227, %cst_93 [1] : vector<8x8xf32> to vector<8xf32>
    %229 = vector.shape_cast %228 : vector<8xf32> to vector<8x1xf32>
    %230 = vector.broadcast %229 : vector<8x1xf32> to vector<8x8xf32>
    %231 = arith.subf %227, %230 : vector<8x8xf32>
    %232 = math.exp %231 : vector<8x8xf32>
    %cst_94 = arith.constant dense<0.000000e+00> : vector<8xf32>
    %233 = vector.multi_reduction <add>, %232, %cst_94 [1] : vector<8x8xf32> to vector<8xf32>
    %234 = vector.shape_cast %233 : vector<8xf32> to vector<8x1xf32>
    %235 = tpu.reciprocal %234 {approx = true} : vector<8x1xf32> -> vector<8x1xf32>
    %236 = vector.broadcast %235 : vector<8x1xf32> to vector<8x8xf32>
    %237 = arith.mulf %232, %236 : vector<8x8xf32>
    %cst_95 = arith.constant dense<0.000000e+00> : vector<8x16xf32>
    %238 = tpu.matmul %237, %221, %cst_95 {dimension_numbers = #tpu.dot_dimension_numbers<[1], [0], [0], [1], [0, 0, 1, 1], [], []>} : vector<8x8xf32>, vector<8x16xf32>, vector<8x16xf32> -> vector<8x16xf32>
    %239 = vector.extract_strided_slice %217 {offsets = [0, 16], sizes = [8, 16], strides = [1, 1]} : vector<16x96xf32> to vector<8x16xf32>
    %240 = vector.extract_strided_slice %217 {offsets = [0, 48], sizes = [8, 16], strides = [1, 1]} : vector<16x96xf32> to vector<8x16xf32>
    %241 = vector.extract_strided_slice %217 {offsets = [0, 80], sizes = [8, 16], strides = [1, 1]} : vector<16x96xf32> to vector<8x16xf32>
    %242 = tpu.transpose %240, [1, 0] : vector<8x16xf32> -> vector<16x8xf32>
    %cst_96 = arith.constant dense<0.000000e+00> : vector<8x8xf32>
    %243 = tpu.matmul %239, %242, %cst_96 {dimension_numbers = #tpu.dot_dimension_numbers<[1], [0], [0], [1], [0, 0, 1, 1], [], []>} : vector<8x16xf32>, vector<16x8xf32>, vector<8x8xf32> -> vector<8x8xf32>
    %cst_97 = arith.constant 2.500000e-01 : f32
    %244 = vector.broadcast %cst_97 : f32 to vector<8x8xf32>
    %245 = arith.mulf %243, %244 : vector<8x8xf32>
    %246 = vector.broadcast %218 : vector<1x8xf32> to vector<8x8xf32>
    %247 = arith.addf %245, %246 : vector<8x8xf32>
    %cst_98 = arith.constant dense<0xFF800000> : vector<8xf32>
    %248 = vector.multi_reduction <maximumf>, %247, %cst_98 [1] : vector<8x8xf32> to vector<8xf32>
    %249 = vector.shape_cast %248 : vector<8xf32> to vector<8x1xf32>
    %250 = vector.broadcast %249 : vector<8x1xf32> to vector<8x8xf32>
    %251 = arith.subf %247, %250 : vector<8x8xf32>
    %252 = math.exp %251 : vector<8x8xf32>
    %cst_99 = arith.constant dense<0.000000e+00> : vector<8xf32>
    %253 = vector.multi_reduction <add>, %252, %cst_99 [1] : vector<8x8xf32> to vector<8xf32>
    %254 = vector.shape_cast %253 : vector<8xf32> to vector<8x1xf32>
    %255 = tpu.reciprocal %254 {approx = true} : vector<8x1xf32> -> vector<8x1xf32>
    %256 = vector.broadcast %255 : vector<8x1xf32> to vector<8x8xf32>
    %257 = arith.mulf %252, %256 : vector<8x8xf32>
    %cst_100 = arith.constant dense<0.000000e+00> : vector<8x16xf32>
    %258 = tpu.matmul %257, %241, %cst_100 {dimension_numbers = #tpu.dot_dimension_numbers<[1], [0], [0], [1], [0, 0, 1, 1], [], []>} : vector<8x8xf32>, vector<8x16xf32>, vector<8x16xf32> -> vector<8x16xf32>
    %259 = tpu.concatenate %238, %258 in 1 : vector<8x16xf32>, vector<8x16xf32> -> vector<8x32xf32>
    %260 = vector.extract_strided_slice %0 {offsets = [1, 0], sizes = [1, 8], strides = [1, 1]} : vector<2x8xf32> to vector<1x8xf32>
    %261 = vector.extract_strided_slice %217 {offsets = [8, 0], sizes = [8, 16], strides = [1, 1]} : vector<16x96xf32> to vector<8x16xf32>
    %262 = vector.extract_strided_slice %217 {offsets = [8, 32], sizes = [8, 16], strides = [1, 1]} : vector<16x96xf32> to vector<8x16xf32>
    %263 = vector.extract_strided_slice %217 {offsets = [8, 64], sizes = [8, 16], strides = [1, 1]} : vector<16x96xf32> to vector<8x16xf32>
    %264 = tpu.transpose %262, [1, 0] : vector<8x16xf32> -> vector<16x8xf32>
    %cst_101 = arith.constant dense<0.000000e+00> : vector<8x8xf32>
    %265 = tpu.matmul %261, %264, %cst_101 {dimension_numbers = #tpu.dot_dimension_numbers<[1], [0], [0], [1], [0, 0, 1, 1], [], []>} : vector<8x16xf32>, vector<16x8xf32>, vector<8x8xf32> -> vector<8x8xf32>
    %cst_102 = arith.constant 2.500000e-01 : f32
    %266 = vector.broadcast %cst_102 : f32 to vector<8x8xf32>
    %267 = arith.mulf %265, %266 : vector<8x8xf32>
    %268 = vector.broadcast %260 : vector<1x8xf32> to vector<8x8xf32>
    %269 = arith.addf %267, %268 : vector<8x8xf32>
    %cst_103 = arith.constant dense<0xFF800000> : vector<8xf32>
    %270 = vector.multi_reduction <maximumf>, %269, %cst_103 [1] : vector<8x8xf32> to vector<8xf32>
    %271 = vector.shape_cast %270 : vector<8xf32> to vector<8x1xf32>
    %272 = vector.broadcast %271 : vector<8x1xf32> to vector<8x8xf32>
    %273 = arith.subf %269, %272 : vector<8x8xf32>
    %274 = math.exp %273 : vector<8x8xf32>
    %cst_104 = arith.constant dense<0.000000e+00> : vector<8xf32>
    %275 = vector.multi_reduction <add>, %274, %cst_104 [1] : vector<8x8xf32> to vector<8xf32>
    %276 = vector.shape_cast %275 : vector<8xf32> to vector<8x1xf32>
    %277 = tpu.reciprocal %276 {approx = true} : vector<8x1xf32> -> vector<8x1xf32>
    %278 = vector.broadcast %277 : vector<8x1xf32> to vector<8x8xf32>
    %279 = arith.mulf %274, %278 : vector<8x8xf32>
    %cst_105 = arith.constant dense<0.000000e+00> : vector<8x16xf32>
    %280 = tpu.matmul %279, %263, %cst_105 {dimension_numbers = #tpu.dot_dimension_numbers<[1], [0], [0], [1], [0, 0, 1, 1], [], []>} : vector<8x8xf32>, vector<8x16xf32>, vector<8x16xf32> -> vector<8x16xf32>
    %281 = vector.extract_strided_slice %217 {offsets = [8, 16], sizes = [8, 16], strides = [1, 1]} : vector<16x96xf32> to vector<8x16xf32>
    %282 = vector.extract_strided_slice %217 {offsets = [8, 48], sizes = [8, 16], strides = [1, 1]} : vector<16x96xf32> to vector<8x16xf32>
    %283 = vector.extract_strided_slice %217 {offsets = [8, 80], sizes = [8, 16], strides = [1, 1]} : vector<16x96xf32> to vector<8x16xf32>
    %284 = tpu.transpose %282, [1, 0] : vector<8x16xf32> -> vector<16x8xf32>
    %cst_106 = arith.constant dense<0.000000e+00> : vector<8x8xf32>
    %285 = tpu.matmul %281, %284, %cst_106 {dimension_numbers = #tpu.dot_dimension_numbers<[1], [0], [0], [1], [0, 0, 1, 1], [], []>} : vector<8x16xf32>, vector<16x8xf32>, vector<8x8xf32> -> vector<8x8xf32>
    %cst_107 = arith.constant 2.500000e-01 : f32
    %286 = vector.broadcast %cst_107 : f32 to vector<8x8xf32>
    %287 = arith.mulf %285, %286 : vector<8x8xf32>
    %288 = vector.broadcast %260 : vector<1x8xf32> to vector<8x8xf32>
    %289 = arith.addf %287, %288 : vector<8x8xf32>
    %cst_108 = arith.constant dense<0xFF800000> : vector<8xf32>
    %290 = vector.multi_reduction <maximumf>, %289, %cst_108 [1] : vector<8x8xf32> to vector<8xf32>
    %291 = vector.shape_cast %290 : vector<8xf32> to vector<8x1xf32>
    %292 = vector.broadcast %291 : vector<8x1xf32> to vector<8x8xf32>
    %293 = arith.subf %289, %292 : vector<8x8xf32>
    %294 = math.exp %293 : vector<8x8xf32>
    %cst_109 = arith.constant dense<0.000000e+00> : vector<8xf32>
    %295 = vector.multi_reduction <add>, %294, %cst_109 [1] : vector<8x8xf32> to vector<8xf32>
    %296 = vector.shape_cast %295 : vector<8xf32> to vector<8x1xf32>
    %297 = tpu.reciprocal %296 {approx = true} : vector<8x1xf32> -> vector<8x1xf32>
    %298 = vector.broadcast %297 : vector<8x1xf32> to vector<8x8xf32>
    %299 = arith.mulf %294, %298 : vector<8x8xf32>
    %cst_110 = arith.constant dense<0.000000e+00> : vector<8x16xf32>
    %300 = tpu.matmul %299, %283, %cst_110 {dimension_numbers = #tpu.dot_dimension_numbers<[1], [0], [0], [1], [0, 0, 1, 1], [], []>} : vector<8x8xf32>, vector<8x16xf32>, vector<8x16xf32> -> vector<8x16xf32>
    %301 = tpu.concatenate %280, %300 in 1 : vector<8x16xf32>, vector<8x16xf32> -> vector<8x32xf32>
    %302 = tpu.concatenate %259, %301 in 0 : vector<8x32xf32>, vector<8x32xf32> -> vector<16x32xf32>
    %303 = arith.truncf %302 : vector<16x32xf32> to vector<16x32xbf16>
    %c1_111 = arith.constant 1 : index
    %c0_112 = arith.constant 0 : index
    %c0_113 = arith.constant 0 : index
    %304 = vector.load %arg6[%c1_111, %c0_112, %c0_113] : memref<2x32x32xbf16, #tpu.memory_space<vmem>>, vector<1x32x32xbf16>
    %305 = vector.shape_cast %304 : vector<1x32x32xbf16> to vector<32x32xbf16>
    %cst_114 = arith.constant dense<0.000000e+00> : vector<16x32xf32>
    %306 = tpu.matmul %303, %305, %cst_114 {dimension_numbers = #tpu.dot_dimension_numbers<[1], [0], [0], [1], [0, 0, 1, 1], [], []>} : vector<16x32xbf16>, vector<32x32xbf16>, vector<16x32xf32> -> vector<16x32xf32>
    %c1_115 = arith.constant 1 : index
    %c0_116 = arith.constant 0 : index
    %c0_117 = arith.constant 0 : index
    %307 = vector.load %arg7[%c1_115, %c0_116, %c0_117] : memref<2x1x32xf32, #tpu.memory_space<vmem>>, vector<1x1x32xf32>
    %308 = vector.shape_cast %307 : vector<1x1x32xf32> to vector<1x32xf32>
    %309 = vector.broadcast %308 : vector<1x32xf32> to vector<16x32xf32>
    %310 = arith.addf %306, %309 : vector<16x32xf32>
    %311 = arith.addf %310, %209 : vector<16x32xf32>
    %c1_118 = arith.constant 1 : index
    %c0_119 = arith.constant 0 : index
    %c0_120 = arith.constant 0 : index
    %312 = vector.load %arg8[%c1_118, %c0_119, %c0_120] : memref<2x1x32xf32, #tpu.memory_space<vmem>>, vector<1x1x32xf32>
    %313 = vector.shape_cast %312 : vector<1x1x32xf32> to vector<1x32xf32>
    %c1_121 = arith.constant 1 : index
    %c0_122 = arith.constant 0 : index
    %c0_123 = arith.constant 0 : index
    %314 = vector.load %arg9[%c1_121, %c0_122, %c0_123] : memref<2x1x32xf32, #tpu.memory_space<vmem>>, vector<1x1x32xf32>
    %315 = vector.shape_cast %314 : vector<1x1x32xf32> to vector<1x32xf32>
    %cst_124 = arith.constant dense<0.000000e+00> : vector<16xf32>
    %316 = vector.multi_reduction <add>, %311, %cst_124 [1] : vector<16x32xf32> to vector<16xf32>
    %317 = vector.shape_cast %316 : vector<16xf32> to vector<16x1xf32>
    %cst_125 = arith.constant 3.200000e+01 : f32
    %318 = vector.broadcast %cst_125 : f32 to vector<16x1xf32>
    %319 = arith.divf %317, %318 : vector<16x1xf32>
    %320 = vector.broadcast %319 : vector<16x1xf32> to vector<16x32xf32>
    %321 = arith.subf %311, %320 : vector<16x32xf32>
    %322 = arith.mulf %321, %321 : vector<16x32xf32>
    %cst_126 = arith.constant dense<0.000000e+00> : vector<16xf32>
    %323 = vector.multi_reduction <add>, %322, %cst_126 [1] : vector<16x32xf32> to vector<16xf32>
    %324 = vector.shape_cast %323 : vector<16xf32> to vector<16x1xf32>
    %cst_127 = arith.constant 3.200000e+01 : f32
    %325 = vector.broadcast %cst_127 : f32 to vector<16x1xf32>
    %326 = arith.divf %324, %325 : vector<16x1xf32>
    %327 = vector.broadcast %319 : vector<16x1xf32> to vector<16x32xf32>
    %328 = arith.subf %311, %327 : vector<16x32xf32>
    %cst_128 = arith.constant 9.99999996E-13 : f32
    %329 = vector.broadcast %cst_128 : f32 to vector<16x1xf32>
    %330 = arith.addf %326, %329 : vector<16x1xf32>
    %331 = math.rsqrt %330 : vector<16x1xf32>
    %332 = vector.broadcast %331 : vector<16x1xf32> to vector<16x32xf32>
    %333 = arith.mulf %328, %332 : vector<16x32xf32>
    %334 = vector.broadcast %313 : vector<1x32xf32> to vector<16x32xf32>
    %335 = arith.mulf %333, %334 : vector<16x32xf32>
    %336 = vector.broadcast %315 : vector<1x32xf32> to vector<16x32xf32>
    %337 = arith.addf %335, %336 : vector<16x32xf32>
    %338 = arith.truncf %337 : vector<16x32xf32> to vector<16x32xbf16>
    %c1_129 = arith.constant 1 : index
    %c0_130 = arith.constant 0 : index
    %c0_131 = arith.constant 0 : index
    %339 = vector.load %arg10[%c1_129, %c0_130, %c0_131] : memref<2x32x64xbf16, #tpu.memory_space<vmem>>, vector<1x32x64xbf16>
    %340 = vector.shape_cast %339 : vector<1x32x64xbf16> to vector<32x64xbf16>
    %cst_132 = arith.constant dense<0.000000e+00> : vector<16x64xf32>
    %341 = tpu.matmul %338, %340, %cst_132 {dimension_numbers = #tpu.dot_dimension_numbers<[1], [0], [0], [1], [0, 0, 1, 1], [], []>} : vector<16x32xbf16>, vector<32x64xbf16>, vector<16x64xf32> -> vector<16x64xf32>
    %c1_133 = arith.constant 1 : index
    %c0_134 = arith.constant 0 : index
    %c0_135 = arith.constant 0 : index
    %342 = vector.load %arg11[%c1_133, %c0_134, %c0_135] : memref<2x1x64xf32, #tpu.memory_space<vmem>>, vector<1x1x64xf32>
    %343 = vector.shape_cast %342 : vector<1x1x64xf32> to vector<1x64xf32>
    %344 = vector.broadcast %343 : vector<1x64xf32> to vector<16x64xf32>
    %345 = arith.addf %341, %344 : vector<16x64xf32>
    %cst_136 = arith.constant 5.000000e-01 : f32
    %346 = vector.broadcast %cst_136 : f32 to vector<16x64xf32>
    %347 = arith.mulf %346, %345 : vector<16x64xf32>
    %cst_137 = arith.constant 4.471500e-02 : f32
    %348 = vector.broadcast %cst_137 : f32 to vector<16x64xf32>
    %349 = arith.mulf %348, %345 : vector<16x64xf32>
    %350 = arith.mulf %349, %345 : vector<16x64xf32>
    %351 = arith.mulf %350, %345 : vector<16x64xf32>
    %352 = arith.addf %345, %351 : vector<16x64xf32>
    %cst_138 = arith.constant 0.797884583 : f32
    %353 = vector.broadcast %cst_138 : f32 to vector<16x64xf32>
    %354 = arith.mulf %353, %352 : vector<16x64xf32>
    %355 = math.tanh %354 : vector<16x64xf32>
    %cst_139 = arith.constant 1.000000e+00 : f32
    %356 = vector.broadcast %cst_139 : f32 to vector<16x64xf32>
    %357 = arith.addf %356, %355 : vector<16x64xf32>
    %358 = arith.mulf %347, %357 : vector<16x64xf32>
    %359 = arith.truncf %358 : vector<16x64xf32> to vector<16x64xbf16>
    %c1_140 = arith.constant 1 : index
    %c0_141 = arith.constant 0 : index
    %c0_142 = arith.constant 0 : index
    %360 = vector.load %arg12[%c1_140, %c0_141, %c0_142] : memref<2x64x32xbf16, #tpu.memory_space<vmem>>, vector<1x64x32xbf16>
    %361 = vector.shape_cast %360 : vector<1x64x32xbf16> to vector<64x32xbf16>
    %cst_143 = arith.constant dense<0.000000e+00> : vector<16x32xf32>
    %362 = tpu.matmul %359, %361, %cst_143 {dimension_numbers = #tpu.dot_dimension_numbers<[1], [0], [0], [1], [0, 0, 1, 1], [], []>} : vector<16x64xbf16>, vector<64x32xbf16>, vector<16x32xf32> -> vector<16x32xf32>
    %c1_144 = arith.constant 1 : index
    %c0_145 = arith.constant 0 : index
    %c0_146 = arith.constant 0 : index
    %363 = vector.load %arg13[%c1_144, %c0_145, %c0_146] : memref<2x1x32xf32, #tpu.memory_space<vmem>>, vector<1x1x32xf32>
    %364 = vector.shape_cast %363 : vector<1x1x32xf32> to vector<1x32xf32>
    %365 = vector.broadcast %364 : vector<1x32xf32> to vector<16x32xf32>
    %366 = arith.addf %362, %365 : vector<16x32xf32>
    %367 = arith.addf %366, %337 : vector<16x32xf32>
    %c1_147 = arith.constant 1 : index
    %c0_148 = arith.constant 0 : index
    %c0_149 = arith.constant 0 : index
    %368 = vector.load %arg14[%c1_147, %c0_148, %c0_149] : memref<2x1x32xf32, #tpu.memory_space<vmem>>, vector<1x1x32xf32>
    %369 = vector.shape_cast %368 : vector<1x1x32xf32> to vector<1x32xf32>
    %c1_150 = arith.constant 1 : index
    %c0_151 = arith.constant 0 : index
    %c0_152 = arith.constant 0 : index
    %370 = vector.load %arg15[%c1_150, %c0_151, %c0_152] : memref<2x1x32xf32, #tpu.memory_space<vmem>>, vector<1x1x32xf32>
    %371 = vector.shape_cast %370 : vector<1x1x32xf32> to vector<1x32xf32>
    %cst_153 = arith.constant dense<0.000000e+00> : vector<16xf32>
    %372 = vector.multi_reduction <add>, %367, %cst_153 [1] : vector<16x32xf32> to vector<16xf32>
    %373 = vector.shape_cast %372 : vector<16xf32> to vector<16x1xf32>
    %cst_154 = arith.constant 3.200000e+01 : f32
    %374 = vector.broadcast %cst_154 : f32 to vector<16x1xf32>
    %375 = arith.divf %373, %374 : vector<16x1xf32>
    %376 = vector.broadcast %375 : vector<16x1xf32> to vector<16x32xf32>
    %377 = arith.subf %367, %376 : vector<16x32xf32>
    %378 = arith.mulf %377, %377 : vector<16x32xf32>
    %cst_155 = arith.constant dense<0.000000e+00> : vector<16xf32>
    %379 = vector.multi_reduction <add>, %378, %cst_155 [1] : vector<16x32xf32> to vector<16xf32>
    %380 = vector.shape_cast %379 : vector<16xf32> to vector<16x1xf32>
    %cst_156 = arith.constant 3.200000e+01 : f32
    %381 = vector.broadcast %cst_156 : f32 to vector<16x1xf32>
    %382 = arith.divf %380, %381 : vector<16x1xf32>
    %383 = vector.broadcast %375 : vector<16x1xf32> to vector<16x32xf32>
    %384 = arith.subf %367, %383 : vector<16x32xf32>
    %cst_157 = arith.constant 9.99999996E-13 : f32
    %385 = vector.broadcast %cst_157 : f32 to vector<16x1xf32>
    %386 = arith.addf %382, %385 : vector<16x1xf32>
    %387 = math.rsqrt %386 : vector<16x1xf32>
    %388 = vector.broadcast %387 : vector<16x1xf32> to vector<16x32xf32>
    %389 = arith.mulf %384, %388 : vector<16x32xf32>
    %390 = vector.broadcast %369 : vector<1x32xf32> to vector<16x32xf32>
    %391 = arith.mulf %389, %390 : vector<16x32xf32>
    %392 = vector.broadcast %371 : vector<1x32xf32> to vector<16x32xf32>
    %393 = arith.addf %391, %392 : vector<16x32xf32>
    %394 = arith.truncf %393 : vector<16x32xf32> to vector<16x32xbf16>
    %c0_158 = arith.constant 0 : index
    %c0_159 = arith.constant 0 : index
    %395 = vector.load %arg16[%c0_158, %c0_159] : memref<32x32xbf16, #tpu.memory_space<vmem>>, vector<32x32xbf16>
    %cst_160 = arith.constant dense<0.000000e+00> : vector<16x32xf32>
    %396 = tpu.matmul %394, %395, %cst_160 {dimension_numbers = #tpu.dot_dimension_numbers<[1], [0], [0], [1], [0, 0, 1, 1], [], []>} : vector<16x32xbf16>, vector<32x32xbf16>, vector<16x32xf32> -> vector<16x32xf32>
    %c0_161 = arith.constant 0 : index
    %c0_162 = arith.constant 0 : index
    %397 = vector.load %arg17[%c0_161, %c0_162] : memref<1x32xf32, #tpu.memory_space<vmem>>, vector<1x32xf32>
    %398 = vector.broadcast %397 : vector<1x32xf32> to vector<16x32xf32>
    %399 = arith.addf %396, %398 : vector<16x32xf32>
    %400 = math.tanh %399 : vector<16x32xf32>
    %401 = arith.truncf %400 : vector<16x32xf32> to vector<16x32xbf16>
    %c0_163 = arith.constant 0 : index
    %c0_164 = arith.constant 0 : index
    %402 = vector.load %arg18[%c0_163, %c0_164] : memref<32x128xbf16, #tpu.memory_space<vmem>>, vector<32x128xbf16>
    %cst_165 = arith.constant dense<0.000000e+00> : vector<16x128xf32>
    %403 = tpu.matmul %401, %402, %cst_165 {dimension_numbers = #tpu.dot_dimension_numbers<[1], [0], [0], [1], [0, 0, 1, 1], [], []>} : vector<16x32xbf16>, vector<32x128xbf16>, vector<16x128xf32> -> vector<16x128xf32>
    %c0_166 = arith.constant 0 : index
    %c0_167 = arith.constant 0 : index
    %404 = vector.load %arg19[%c0_166, %c0_167] : memref<1x128xf32, #tpu.memory_space<vmem>>, vector<1x128xf32>
    %405 = vector.broadcast %404 : vector<1x128xf32> to vector<16x128xf32>
    %406 = arith.addf %403, %405 : vector<16x128xf32>
    %c0_168 = arith.constant 0 : index
    %c0_169 = arith.constant 0 : index
    %407 = vector.load %arg20[%c0_168, %c0_169] : memref<16x128xf32, #tpu.memory_space<vmem>>, vector<16x128xf32>
    tpu.vector_store %arg20[%c0_168, %c0_169], %406 {strides = array<i32>} : memref<16x128xf32, #tpu.memory_space<vmem>>, vector<16x128xf32>,
    return
  }
}

</mosaic_0001>

<bundles_post_ra>
// kernel: tpu_custom_call.1
= control target key start
LH: loop header
LB: loop body
LE: loop exit
PB: predicated region body
PF: predicated region fallthrough
CT: control target
= control target key end

     0   :  { %s4065_s0 = inlined_call_operand.hbm [shape: f32[16,32], index: 0, kind: input, shape index: {}]   ;;  %s4066_s1 = inlined_call_operand.hbm [shape: f32[2,8], index: 1, kind: input, shape index: {}]   ;;  %s4067_s2 = inlined_call_operand.hbm [shape: f32[1,32], index: 2, kind: input, shape index: {}]   ;;  %s4068_s3 = inlined_call_operand.hbm [shape: f32[1,32], index: 3, kind: input, shape index: {}]   ;;  %s4069_s4 = inlined_call_operand.vmem [shape: bf16[2,32,96], index: 4, kind: input, shape index: {}]   ;;  %s4070_s5 = inlined_call_operand.hbm [shape: f32[2,1,96], index: 5, kind: input, shape index: {}]   ;;  %s4071_s6 = inlined_call_operand.vmem [shape: bf16[2,32,32], index: 6, kind: input, shape index: {}]   ;;  %s4072_s7 = inlined_call_operand.hbm [shape: f32[2,1,32], index: 7, kind: input, shape index: {}]   ;;  %s4073_s8 = inlined_call_operand.hbm [shape: f32[2,1,32], index: 8, kind: input, shape index: {}]   ;;  %s4074_s9 = inlined_call_operand.hbm [shape: f32[2,1,32], index: 9, kind: input, shape index: {}]   ;;  %s4075_s10 = inlined_call_operand.vmem [shape: bf16[2,32,64], index: 10, kind: input, shape index: {}]   ;;  %s4076_s11 = inlined_call_operand.hbm [shape: f32[2,1,64], index: 11, kind: input, shape index: {}]   ;;  %s4077_s12 = inlined_call_operand.vmem [shape: bf16[2,64,32], index: 12, kind: input, shape index: {}]   ;;  %s4078_s13 = inlined_call_operand.hbm [shape: f32[2,1,32], index: 13, kind: input, shape index: {}]   ;;  %s4079_s14 = inlined_call_operand.hbm [shape: f32[2,1,32], index: 14, kind: input, shape index: {}]   ;;  %s4080_s15 = inlined_call_operand.hbm [shape: f32[2,1,32], index: 15, kind: input, shape index: {}]   ;;  %s4081_s16 = inlined_call_operand.vmem [shape: bf16[32,32], index: 16, kind: input, shape index: {}]   ;;  %s4082_s17 = inlined_call_operand.hbm [shape: f32[1,32], index: 17, kind: input, shape index: {}]   ;;  %s4083_s18 = inlined_call_operand.vmem [shape: bf16[32,128], index: 18, kind: input, shape index: {}]   ;;  %s4084_s19 = inlined_call_operand.vmem [shape: f32[1,128], index: 19, kind: input, shape index: {}]   ;;  %s4085_s20 = inlined_call_operand.hbm [shape: f32[16,128], index: 20, kind: output, shape index: {}]  }
   0x1   :  { %4093 = sst [smem:[#allocation32_spill]] %s4065_s0 }
   0x2   :  { %4094 = sst [smem:[#allocation33_spill]] %s4066_s1 }
   0x3   :  { %4095 = sst [smem:[#allocation34_spill]] %s4067_s2 }
   0x4   :  { %4096 = sst [smem:[#allocation35_spill]] %s4068_s3 }
   0x5   :  { %4097 = sst [smem:[#allocation36_spill]] %s4069_s4 }
   0x6   :  { %25 = vsyncpa [#allocation3], 0 }
   0x7   :  { %26 = vsyncpa [#allocation6], 0 }
   0x8   :  { %27 = vsyncpa [#allocation9], 0 }
   0x9   :  { %28 = vsyncpa [#allocation12], 0 }
   0xa   :  { %29 = vsyncpa [#allocation15], 0 }
   0xb   :  { %30 = vsyncpa [#allocation18], 0 }
   0xc   :  { %31 = vsyncpa [#allocation21], 0 }
   0xd   :  { %32 = vsyncpa [#allocation4], 0  ;;  %s3397_s1 = smov [#allocation5]   ;;  %s3398_s23 = smov [#allocation8]  }
   0xe   :  { %s51_s22 = sshll.u32 %s3397_s1, 4  ;;  %s71_s24 = sshll.u32 %s3398_s23, 4  ;;  %s52_s22 = int_to_ptr.vmem [resolvable:$true] %s51_s22  ;;  %s72_s24 = int_to_ptr.vmem [resolvable:$true] %s71_s24 }
   0xf   :  { %s4098_s3 = sld [smem:[#allocation33_spill]] }
  0x15   :  { %s3073_s26 = scalar_lea.hbm %s4098_s3, 32 }
  0x16   :  { %p3074_p0 = scmp.ne.s32.totalorder %s4098_s3, %s3073_s26  ;;  %p3077_p1 = scmp.lt.u32.totalorder %s3073_s26, %s4098_s3 }
  0x18   :  { %p3079_p2 = pnand %p3077_p1, %p3074_p0 }
  0x1a   :  { %3082 = shalt.err (!%p3079_p2)
}
  0x1b   :  { %s3083_s30 = scalar_lea.vmem %s52_s22, 32  ;;  %p3088_p4 = scmp.lt.s32.totalorder %s52_s22, %s52_s22 }
  0x1c   :  { %p3084_p3 = scmp.ne.s32.totalorder %s52_s22, %s3083_s30  ;;  %p3089_p5 = scmp.lt.s32.totalorder %s3083_s30, %s3083_s30 }
  0x1e   :  { %p3090_p6 = por %p3089_p5, %p3088_p4 }
  0x20   :  { %p3091_p7 = pnand %p3090_p6, %p3084_p3 }
  0x22   :  { %3094 = shalt.err (!%p3091_p7)
}
  0x23   :  { %54 = dma.hbm_to_vmem [thread:$0]  %s4098_s3, 32, %s52_s22, [#allocation6]  }
  0x24   :  { %s4099_s2 = sld [smem:[#allocation35_spill]] }
  0x2a   :  { %s3095_s25 = scalar_lea.hbm %s4099_s2, 16 }
  0x2b   :  { %p3096_p8 = scmp.ne.s32.totalorder %s4099_s2, %s3095_s25  ;;  %p3099_p9 = scmp.lt.u32.totalorder %s3095_s25, %s4099_s2 }
  0x2d   :  { %p3101_p10 = pnand %p3099_p9, %p3096_p8 }
  0x2f   :  { %3104 = shalt.err (!%p3101_p10)
}
  0x30   :  { %s3105_s29 = scalar_lea.vmem %s72_s24, 16  ;;  %s3109_s30 = scalar_lea.vmem %s72_s24, 32 }
  0x31   :  { %p3106_p11 = scmp.ne.s32.totalorder %s72_s24, %s3105_s29  ;;  %p3110_p12 = scmp.lt.s32.totalorder %s72_s24, %s72_s24 }
  0x32   :  { %p3111_p13 = scmp.lt.s32.totalorder %s3109_s30, %s3105_s29 }
  0x34   :  { %p3112_p0 = por %p3111_p13, %p3110_p12 }
  0x36   :  { %p3113_p1 = pnand %p3112_p0, %p3106_p11 }
  0x38   :  { %3116 = shalt.err (!%p3113_p1)
}
  0x39   :  { %74 = dma.hbm_to_vmem [thread:$0]  %s4099_s2, 16, %s72_s24, [#allocation9]  }
  0x3a   :  { %s3399_s0 = smov [#allocation11]   ;;  %s3400_s1 = smov [#allocation14]  }
  0x3b   :  { %s96_s21 = sshll.u32 %s3399_s0, 4  ;;  %s120_s23 = sshll.u32 %s3400_s1, 4  ;;  %s97_s21 = int_to_ptr.vmem [resolvable:$true] %s96_s21  ;;  %s3551_s23 = int_to_ptr.vmem [resolvable:$true] %s120_s23 }
  0x3c   :  { %s3117_s28 = scalar_lea.hbm %s4072_s7, 32 }
  0x3d   :  { %p3118_p2 = scmp.ne.s32.totalorder %s4072_s7, %s3117_s28  ;;  %p3121_p3 = scmp.lt.u32.totalorder %s3117_s28, %s4072_s7 }
  0x3f   :  { %p3123_p4 = pnand %p3121_p3, %p3118_p2 }
  0x41   :  { %3126 = shalt.err (!%p3123_p4)
}
  0x42   :  { %s3127_s24 = scalar_lea.vmem %s97_s21, 32  ;;  %p3132_p6 = scmp.lt.s32.totalorder %s97_s21, %s97_s21 }
  0x43   :  { %p3128_p5 = scmp.ne.s32.totalorder %s97_s21, %s3127_s24  ;;  %p3133_p7 = scmp.lt.s32.totalorder %s3127_s24, %s3127_s24 }
  0x45   :  { %p3134_p8 = por %p3133_p7, %p3132_p6 }
  0x47   :  { %p3135_p9 = pnand %p3134_p8, %p3128_p5 }
  0x49   :  { %3138 = shalt.err (!%p3135_p9)
}
  0x4a   :  { %s4091_s2 = smov 16   ;;  %s3402_s22 = smov 1  }
  0x4b   :  { %102 = dma.hbm_to_vmem [thread:$0]  %s4072_s7, 32, %s97_s21, [#allocation12], %s4091_s2, %s4091_s2, %s3402_s22  }
  0x4c   :  { %s3139_s27 = scalar_lea.hbm %s4074_s9, 32 }
  0x4d   :  { %p3140_p10 = scmp.ne.s32.totalorder %s4074_s9, %s3139_s27  ;;  %p3143_p11 = scmp.lt.u32.totalorder %s3139_s27, %s4074_s9 }
  0x4f   :  { %p3145_p12 = pnand %p3143_p11, %p3140_p10 }
  0x51   :  { %3148 = shalt.err (!%p3145_p12)
}
  0x52   :  { %s3149_s30 = scalar_lea.vmem %s3551_s23, 32  ;;  %p3154_p0 = scmp.lt.s32.totalorder %s3551_s23, %s3551_s23 }
  0x53   :  { %p3150_p13 = scmp.ne.s32.totalorder %s3551_s23, %s3149_s30  ;;  %p3155_p1 = scmp.lt.s32.totalorder %s3149_s30, %s3149_s30 }
  0x55   :  { %p3156_p2 = por %p3155_p1, %p3154_p0 }
  0x57   :  { %p3157_p3 = pnand %p3156_p2, %p3150_p13 }
  0x59   :  { %3160 = shalt.err (!%p3157_p3)
}
  0x5a   :  { %126 = dma.hbm_to_vmem [thread:$0]  %s4074_s9, 32, %s3551_s23, [#allocation15], %s4091_s2, %s4091_s2, %s3402_s22  }
  0x5b   :  { %s3403_s24 = smov [#allocation17]   ;;  %s3404_s0 = smov [#allocation20]  }
  0x5c   :  { %s148_s3 = sshll.u32 %s3403_s24, 4  ;;  %s172_s1 = sshll.u32 %s3404_s0, 4  ;;  %s149_s3 = int_to_ptr.vmem [resolvable:$true] %s148_s3  ;;  %s3588_s1 = int_to_ptr.vmem [resolvable:$true] %s172_s1 }
  0x5d   :  { %s3161_s28 = scalar_lea.hbm %s4078_s13, 32 }
  0x5e   :  { %p3162_p4 = scmp.ne.s32.totalorder %s4078_s13, %s3161_s28  ;;  %p3165_p5 = scmp.lt.u32.totalorder %s3161_s28, %s4078_s13 }
  0x60   :  { %p3167_p6 = pnand %p3165_p5, %p3162_p4 }
  0x62   :  { %3170 = shalt.err (!%p3167_p6)
}
  0x63   :  { %s3171_s9 = scalar_lea.vmem %s149_s3, 32  ;;  %p3176_p8 = scmp.lt.s32.totalorder %s149_s3, %s149_s3 }
  0x64   :  { %p3172_p7 = scmp.ne.s32.totalorder %s149_s3, %s3171_s9  ;;  %p3177_p9 = scmp.lt.s32.totalorder %s3171_s9, %s3171_s9 }
  0x66   :  { %p3178_p10 = por %p3177_p9, %p3176_p8 }
  0x68   :  { %p3179_p11 = pnand %p3178_p10, %p3172_p7 }
  0x6a   :  { %3182 = shalt.err (!%p3179_p11)
}
  0x6b   :  { %154 = dma.hbm_to_vmem [thread:$0]  %s4078_s13, 32, %s149_s3, [#allocation18], %s4091_s2, %s4091_s2, %s3402_s22  }
  0x6c   :  { %s3183_s0 = scalar_lea.hbm %s4080_s15, 32 }
  0x6d   :  { %p3184_p12 = scmp.ne.s32.totalorder %s4080_s15, %s3183_s0  ;;  %p3187_p13 = scmp.lt.u32.totalorder %s3183_s0, %s4080_s15 }
  0x6f   :  { %p3189_p0 = pnand %p3187_p13, %p3184_p12 }
  0x71   :  { %3192 = shalt.err (!%p3189_p0)
}
  0x72   :  { %s3193_s4 = scalar_lea.vmem %s3588_s1, 32  ;;  %p3198_p2 = scmp.lt.s32.totalorder %s3588_s1, %s3588_s1 }
  0x73   :  { %p3194_p1 = scmp.ne.s32.totalorder %s3588_s1, %s3193_s4  ;;  %p3199_p3 = scmp.lt.s32.totalorder %s3193_s4, %s3193_s4 }
  0x75   :  { %p3200_p4 = por %p3199_p3, %p3198_p2 }
  0x77   :  { %p3201_p5 = pnand %p3200_p4, %p3194_p1 }
  0x79   :  { %3204 = shalt.err (!%p3201_p5)
}
  0x7a   :  { %178 = dma.hbm_to_vmem [thread:$0]  %s4080_s15, 32, %s3588_s1, [#allocation21], %s4091_s2, %s4091_s2, %s3402_s22  }
  0x7b   :  { %s3405_s29 = smov [#allocation2]   ;;  %s4100_s7 = sld [smem:[#allocation32_spill]] }
  0x7c   :  { %s38_s30 = sshll.u32 %s3405_s29, 4  ;;  %s39_s30 = int_to_ptr.vmem [resolvable:$true] %s38_s30 }
  0x81   :  { %s3205_s21 = scalar_lea.hbm %s4100_s7, 256 }
  0x82   :  { %p3206_p6 = scmp.ne.s32.totalorder %s4100_s7, %s3205_s21  ;;  %p3209_p7 = scmp.lt.u32.totalorder %s3205_s21, %s4100_s7 }
  0x84   :  { %p3211_p8 = pnand %p3209_p7, %p3206_p6 }
  0x86   :  { %3214 = shalt.err (!%p3211_p8)
}
  0x87   :  { %s3215_s28 = scalar_lea.vmem %s39_s30, 256  ;;  %p3220_p10 = scmp.lt.s32.totalorder %s39_s30, %s39_s30 }
  0x88   :  { %p3216_p9 = scmp.ne.s32.totalorder %s39_s30, %s3215_s28  ;;  %p3221_p11 = scmp.lt.s32.totalorder %s3215_s28, %s3215_s28 }
  0x8a   :  { %p3222_p12 = por %p3221_p11, %p3220_p10 }
  0x8c   :  { %p3223_p13 = pnand %p3222_p12, %p3216_p9 }
  0x8e   :  { %3226 = shalt.err (!%p3223_p13)
}
  0x8f   :  { %s3406_s15 = smov 128   ;;  %s3407_s1 = smov 8  }
  0x90   :  { %44 = dma.hbm_to_vmem [thread:$0]  %s4100_s7, 256, %s39_s30, [#allocation3], %s3406_s15, %s3406_s15, %s3407_s1  }
  0x91   :  { %s3408_s13 = smov [#allocation7]   ;;  %s3409_s29 = smov [#allocation10]  }
  0x92   :  { %s61_s3 = sshll.u32 %s3408_s13, 4  ;;  %s82_s9 = sshll.u32 %s3409_s29, 4  ;;  %s62_s3 = int_to_ptr.vmem [resolvable:$true] %s61_s3  ;;  %s83_s9 = int_to_ptr.vmem [resolvable:$true] %s82_s9 }
  0x93   :  { %s4101_s24 = sld [smem:[#allocation34_spill]] }
  0x99   :  { %s3227_s0 = scalar_lea.hbm %s4101_s24, 16 }
  0x9a   :  { %p3228_p0 = scmp.ne.s32.totalorder %s4101_s24, %s3227_s0  ;;  %p3231_p1 = scmp.lt.u32.totalorder %s3227_s0, %s4101_s24 }
  0x9c   :  { %p3233_p2 = pnand %p3231_p1, %p3228_p0 }
  0x9e   :  { %3236 = shalt.err (!%p3233_p2)
}
  0x9f   :  { %s3237_s30 = scalar_lea.vmem %s62_s3, 16  ;;  %s3241_s7 = scalar_lea.vmem %s62_s3, 32 }
  0xa0   :  { %p3238_p3 = scmp.ne.s32.totalorder %s62_s3, %s3237_s30  ;;  %p3242_p4 = scmp.lt.s32.totalorder %s62_s3, %s62_s3 }
  0xa1   :  { %p3243_p5 = scmp.lt.s32.totalorder %s3241_s7, %s3237_s30 }
  0xa3   :  { %p3244_p6 = por %p3243_p5, %p3242_p4 }
  0xa5   :  { %p3245_p7 = pnand %p3244_p6, %p3238_p3 }
  0xa7   :  { %3248 = shalt.err (!%p3245_p7)
}
  0xa8   :  { %64 = dma.hbm_to_vmem [thread:$0]  %s4101_s24, 16, %s62_s3, [#allocation6]  }
  0xa9   :  { %s3249_s2 = scalar_lea.hbm %s4070_s5, 32 }
  0xaa   :  { %p3250_p8 = scmp.ne.s32.totalorder %s4070_s5, %s3249_s2  ;;  %p3253_p9 = scmp.lt.u32.totalorder %s3249_s2, %s4070_s5 }
  0xac   :  { %p3255_p10 = pnand %p3253_p9, %p3250_p8 }
  0xae   :  { %3258 = shalt.err (!%p3255_p10)
}
  0xaf   :  { %s3259_s27 = scalar_lea.vmem %s83_s9, 32  ;;  %p3264_p12 = scmp.lt.s32.totalorder %s83_s9, %s83_s9 }
  0xb0   :  { %p3260_p11 = scmp.ne.s32.totalorder %s83_s9, %s3259_s27  ;;  %p3265_p13 = scmp.lt.s32.totalorder %s3259_s27, %s3259_s27 }
  0xb2   :  { %p3266_p0 = por %p3265_p13, %p3264_p12 }
  0xb4   :  { %p3267_p1 = pnand %p3266_p0, %p3260_p11 }
  0xb6   :  { %3270 = shalt.err (!%p3267_p1)
}
  0xb7   :  { %s4102_s3 = smov 16   ;;  %s3410_s30 = smov [#allocation13]  }
  0xb8   :  { %88 = dma.hbm_to_vmem [thread:$0]  %s4070_s5, 32, %s83_s9, [#allocation9], %s4102_s3, %s4102_s3, %s3402_s22  }
  0xb9   :  { %s108_s7 = sshll.u32 %s3410_s30, 4  ;;  %s3411_s26 = smov [#allocation16]   ;;  %s109_s7 = int_to_ptr.vmem [resolvable:$true] %s108_s7 }
  0xba   :  { %s134_s4 = sshll.u32 %s3411_s26, 4  ;;  %s3271_s2 = scalar_lea.hbm %s4073_s8, 32  ;;  %s135_s4 = int_to_ptr.vmem [resolvable:$true] %s134_s4 }
  0xbb   :  { %p3272_p2 = scmp.ne.s32.totalorder %s4073_s8, %s3271_s2  ;;  %p3275_p3 = scmp.lt.u32.totalorder %s3271_s2, %s4073_s8 }
  0xbd   :  { %p3277_p4 = pnand %p3275_p3, %p3272_p2 }
  0xbf   :  { %3280 = shalt.err (!%p3277_p4)
}
  0xc0   :  { %s3281_s5 = scalar_lea.vmem %s109_s7, 32  ;;  %p3286_p6 = scmp.lt.s32.totalorder %s109_s7, %s109_s7 }
  0xc1   :  { %p3282_p5 = scmp.ne.s32.totalorder %s109_s7, %s3281_s5  ;;  %p3287_p7 = scmp.lt.s32.totalorder %s3281_s5, %s3281_s5 }
  0xc3   :  { %p3288_p8 = por %p3287_p7, %p3286_p6 }
  0xc5   :  { %p3289_p9 = pnand %p3288_p8, %p3282_p5 }
  0xc7   :  { %3292 = shalt.err (!%p3289_p9)
}
  0xc8   :  { %114 = dma.hbm_to_vmem [thread:$0]  %s4073_s8, 32, %s109_s7, [#allocation12], %s4102_s3, %s4102_s3, %s3402_s22  }
  0xc9   :  { %s3293_s30 = scalar_lea.hbm %s4076_s11, 32 }
  0xca   :  { %p3294_p10 = scmp.ne.s32.totalorder %s4076_s11, %s3293_s30  ;;  %p3297_p11 = scmp.lt.u32.totalorder %s3293_s30, %s4076_s11 }
  0xcc   :  { %p3299_p12 = pnand %p3297_p11, %p3294_p10 }
  0xce   :  { %3302 = shalt.err (!%p3299_p12)
}
  0xcf   :  { %s3303_s23 = scalar_lea.vmem %s135_s4, 32  ;;  %p3308_p0 = scmp.lt.s32.totalorder %s135_s4, %s135_s4 }
  0xd0   :  { %p3304_p13 = scmp.ne.s32.totalorder %s135_s4, %s3303_s23  ;;  %p3309_p1 = scmp.lt.s32.totalorder %s3303_s23, %s3303_s23 }
  0xd2   :  { %p3310_p2 = por %p3309_p1, %p3308_p0 }
  0xd4   :  { %p3311_p3 = pnand %p3310_p2, %p3304_p13 }
  0xd6   :  { %3314 = shalt.err (!%p3311_p3)
}
  0xd7   :  { %140 = dma.hbm_to_vmem [thread:$0]  %s4076_s11, 32, %s135_s4, [#allocation15], %s4102_s3, %s4102_s3, %s3402_s22  }
  0xd8   :  { %s3412_s21 = smov [#allocation19]   ;;  %s3413_s25 = smov [#allocation22]  }
  0xd9   :  { %s160_s0 = sshll.u32 %s3412_s21, 4  ;;  %s187_s5 = sshll.u32 %s3413_s25, 4  ;;  %s161_s0 = int_to_ptr.vmem [resolvable:$true] %s160_s0  ;;  %s188_s5 = int_to_ptr.vmem [resolvable:$true] %s187_s5 }
  0xda   :  { %s3315_s24 = scalar_lea.hbm %s4079_s14, 32 }
  0xdb   :  { %p3316_p4 = scmp.ne.s32.totalorder %s4079_s14, %s3315_s24  ;;  %p3319_p5 = scmp.lt.u32.totalorder %s3315_s24, %s4079_s14 }
  0xdd   :  { %p3321_p6 = pnand %p3319_p5, %p3316_p4 }
  0xdf   :  { %3324 = shalt.err (!%p3321_p6)
}
  0xe0   :  { %s3325_s11 = scalar_lea.vmem %s161_s0, 32  ;;  %p3330_p8 = scmp.lt.s32.totalorder %s161_s0, %s161_s0 }
  0xe1   :  { %p3326_p7 = scmp.ne.s32.totalorder %s161_s0, %s3325_s11  ;;  %p3331_p9 = scmp.lt.s32.totalorder %s3325_s11, %s3325_s11 }
  0xe3   :  { %p3332_p10 = por %p3331_p9, %p3330_p8 }
  0xe5   :  { %p3333_p11 = pnand %p3332_p10, %p3326_p7 }
  0xe7   :  { %3336 = shalt.err (!%p3333_p11)
}
  0xe8   :  { %166 = dma.hbm_to_vmem [thread:$0]  %s4079_s14, 32, %s161_s0, [#allocation18], %s4102_s3, %s4102_s3, %s3402_s22  }
  0xe9   :  { %s3337_s8 = scalar_lea.hbm %s4082_s17, 16 }
  0xea   :  { %p3338_p12 = scmp.ne.s32.totalorder %s4082_s17, %s3337_s8  ;;  %p3341_p13 = scmp.lt.u32.totalorder %s3337_s8, %s4082_s17 }
  0xec   :  { %p3343_p0 = pnand %p3341_p13, %p3338_p12 }
  0xee   :  { %3346 = shalt.err (!%p3343_p0)
}
  0xef   :  { %s3347_s27 = scalar_lea.vmem %s188_s5, 16  ;;  %s3351_s24 = scalar_lea.vmem %s188_s5, 32 }
  0xf0   :  { %p3348_p1 = scmp.ne.s32.totalorder %s188_s5, %s3347_s27  ;;  %p3352_p2 = scmp.lt.s32.totalorder %s188_s5, %s188_s5 }
  0xf1   :  { %p3353_p3 = scmp.lt.s32.totalorder %s3351_s24, %s3347_s27 }
  0xf3   :  { %p3354_p4 = por %p3353_p3, %p3352_p2 }
  0xf5   :  { %p3355_p5 = pnand %p3354_p4, %p3348_p1 }
  0xf7   :  { %3358 = shalt.err (!%p3355_p5)
}
  0xf8   :  { %190 = dma.hbm_to_vmem [thread:$0]  %s4082_s17, 16, %s188_s5, [#allocation21]  }
  0xf9   :  { %3381 = dma.done.wait [#allocation3], 256  }
  0xfa   :  { %3382 = vsyncadd [#allocation3], 4294967040 }
  0xfb   :  { %3383 = dma.done.wait [#allocation6], 48  }
  0xfc   :  { %3384 = vsyncadd [#allocation6], 4294967248 }
  0xfd   :  { %3385 = dma.done.wait [#allocation9], 48  }
  0xfe   :  { %3386 = vsyncadd [#allocation9], 4294967248 }
  0xff   :  { %3387 = dma.done.wait [#allocation12], 64  }
 0x100   :  { %3388 = vsyncadd [#allocation12], 4294967232 }
 0x101   :  { %3389 = dma.done.wait [#allocation15], 64  }
 0x102   :  { %3390 = vsyncadd [#allocation15], 4294967232 }
 0x103   :  { %3391 = dma.done.wait [#allocation18], 64  }
 0x104   :  { %3392 = vsyncadd [#allocation18], 4294967232 }
 0x105   :  { %3393 = dma.done.wait [#allocation21], 48  }
 0x106   :  { %3394 = vsyncadd [#allocation21], 4294967248  ;;  %vm240_vm0 = vcmask 261120   ;;  %v236_v0 = vld [vmem:[#allocation2] sm:$0xff]  ;;  %v237_v1 = vld [vmem:[#allocation2 + $0x8] sm:$0xff]  ;;  %s4103_s5 = sld [smem:[#allocation36_spill]]  ;;  %v431_v42 = vlaneseq }
 0x107   :  { %v241_v2 = vsel %vm240_vm0, %v236_v0, 0.0  ;;  %v244_v3 = vsel %vm240_vm0, %v237_v1, 0.0  ;;  %v3414_v15 = vmov 0.0   ;;  %vm3415_vm1 = vmmov 0   ;;  %v2618_v25 = vld [vmem:[#allocation7] ss:$0 sm:$0xff] }
 0x108   :  { %242 = vadd.xlane.f32.xlu0 %v241_v2  ;;  %2782 = vmatprep.subr.bf16.mxu0 %v3414_v15  ;;  %v2619_v29 = vld [vmem:[#allocation8] ss:$0 sm:$0xff]  ;;  %v2620_v34 = vld [vmem:[#allocation10] ss:$0 sm:$0xff]  ;;  %s3416_s26 = smov 96   ;;  %s3417_s13 = smov 80  }
 0x109   :  { %2790 = vmatprep.subr.mxu1 %v3414_v15  ;;  %2786 = vmatprep.mubr.msk.bf16.mxu0 %vm3415_vm1, %v3414_v15  ;;  %s3418_s11 = smov 112   ;;  %vm355_vm2 = vcmask 130048   ;;  %v432_v43 = vshrl.u32 %v431_v42, 7  ;;  %v235_v45 = vld [vmem:[#allocation5] sm:$0x3]  ;;  %vm436_vm3 = vcmask 64512  }
 0x10a   :  { %2792 = vmatprep.mubr.msk.f32.mxu1 %vm3415_vm1, %v3414_v15  ;;  %s3419_s4 = smov 64   ;;  %s3420_s29 = smov 48   ;;  %vm1278_vm4 = vcmask 523264  }
 0x10b   :  { %v433_v44 = vsub.s32 0, %v432_v43 }
 0x10c   :  { %245 = vadd.xlane.f32.xlu0 %v244_v3  ;;  %v2985_v14 = vld [vmem:[%s4103_s5] sm:$0xff]   ;;  %v2986_v16 = vld [vmem:[%s4103_s5 + $0x8] sm:$0xff]  }
 0x10d   :  { %2783 = vmatpush3.bf16.msra.mxu0 %v2985_v14  ;;  %v3769_v46 = vrot.slane %v235_v45, %v433_v44 }
 0x10e   :  { %2784 = vmatprep.subr.bf16.mxu0 %v3414_v15 }
 0x111   :  { %2785 = vmatpush3.bf16.msra.mxu0 %v2986_v16 }
 0x112   :  { %2805 = vmatprep.subr.mxu0 %v3414_v15 }
 0x195   :  { %v243_v4 = vpop.xlane.xlu0 %242 }
 0x196   :  { %v248_v5 = vmul.f32 0.03125, %v243_v4  ;;  %v776_v4 = vsub.s32 1, %v432_v43 }
 0x198   :  { %v250_v6 = vsub.f32 %v236_v0, %v248_v5 }
 0x199   :  { %v246_v7 = vpop.xlane.xlu0 %245 }
 0x19a   :  { %v249_v8 = vmul.f32 0.03125, %v246_v7  ;;  %v252_v9 = vmul.f32 %v250_v6, %v250_v6 }
 0x19c   :  { %v251_v10 = vsub.f32 %v237_v1, %v249_v8  ;;  %v254_v11 = vsel %vm240_vm0, %v252_v9, 0.0  ;;  %v3803_v9 = vrot.slane %v235_v45, %v776_v4  ;;  %v2636_v4 = vld [vmem:[#allocation11] ss:$0 sm:$0xff] }
 0x19d   :  { %255 = vadd.xlane.f32.xlu1 %v254_v11 }
 0x19e   :  { %v253_v12 = vmul.f32 %v251_v10, %v251_v10 }
 0x1a0   :  { %v257_v13 = vsel %vm240_vm0, %v253_v12, 0.0 }
 0x1a1   :  { %258 = vadd.xlane.f32.xlu1 %v257_v13 }
 0x22a   :  { %v256_v17 = vpop.xlane.xlu1 %255 }
 0x22b   :  { %v260_v18 = vmul.f32 0.03125, %v256_v17 }
 0x22d   :  { %v262_v19 = vadd.f32 1e-12, %v260_v18 }
 0x22e   :  { %v259_v20 = vpop.xlane.xlu1 %258 }
 0x22f   :  { %3009 = vrsqrt.f32 %v262_v19  ;;  %v261_v21 = vmul.f32 0.03125, %v259_v20 }
 0x231   :  { %v263_v22 = vadd.f32 1e-12, %v261_v21 }
 0x233   :  { %3011 = vrsqrt.f32 %v263_v22 }
 0x239   :  { %v3010_v23 = vpop.eup %3009 }
 0x23a   :  { %v266_v24 = vmul.f32 %v3010_v23, %v250_v6 }
 0x23c   :  { %v274_v28 = vmul.f32 %v2618_v25, %v266_v24 }
 0x23d   :  { %v3012_v26 = vpop.eup %3011 }
 0x23e   :  { %v267_v27 = vmul.f32 %v3012_v26, %v251_v10  ;;  %v3742_v31 = vadd.f32 %v2619_v29, %v274_v28 }
 0x240   :  { %v275_v30 = vmul.f32 %v2618_v25, %v267_v27 }
 0x242   :  { %v3744_v32 = vadd.f32 %v2619_v29, %v275_v30 }
 0x244   :  { %v284_v33 = vpack.c.bf16 %v3744_v32, %v3742_v31 }
 0x246   :  { %2787 = vmatmul.mubr.msk.bf16.vlgmr.msra.gmra.mrb[0].mxu0 %vm240_vm0, %v284_v33 }
 0x247   :  { %2807 = vmatprep.mubr.msk.f32.mxu0 %vm3415_vm1, %v3414_v15 }
 0x319   :  { %v345_v35 = vpop.f32.mrb[0].mxu0 }
 0x31a   :  { %v3751_v36 = vadd.f32 %v2620_v34, %v345_v35  ;;  %v2788_v37 = vpop.f32.mrb[1].mxu0 }
 0x31b   :  { %v348_v38 = vpop.f32.mrb[2].mxu0 }
 0x31c   :  { %353 = vrot.lane.b32.xlu0 %v3751_v36, %s3416_s26  ;;  %v2789_v39 = vpop.f32.mrb[3].mxu0  ;;  %v3757_v40 = vadd.f32 %v2620_v34, %v348_v38 }
 0x320   :  { %526 = vrot.lane.b32.xlu0 %v3751_v36, %s3417_s13 }
 0x324   :  { %697 = vrot.lane.b32.xlu0 %v3757_v40, %s3416_s26 }
 0x328   :  { %866 = vrot.lane.b32.xlu0 %v3757_v40, %s3418_s11 }
 0x38e   :  { %v354_v41 = vpop.permute.xlu0 %353 }
 0x38f   :  { %2791 = vmatpush3.xpose.msk.msra.mxu1 %vm355_vm2, %v354_v41 }
 0x390   :  { %2795 = vmatprep.subr.mxu1 %v3414_v15 }
 0x392   :  { %2793 = vmatmul.mubr.msk.f32.vlgmr.msra.gmra.mrb[0].mxu1 %vm355_vm2, %v3751_v36  ;;  %v527_v61 = vpop.permute.xlu0 %526 }
 0x393   :  { %2797 = vmatprep.mubr.msk.f32.mxu1 %vm3415_vm1, %v3414_v15 }
 0x396   :  { %v698_v63 = vpop.permute.xlu0 %697 }
 0x39a   :  { %v867_v1 = vpop.permute.xlu0 %866 }
 0x465   :  { %v426_v47 = vpop.f32.mrb[0].mxu1 }
 0x466   :  { %v430_v48 = vmul.f32 0.25, %v426_v47  ;;  %v2794_v49 = vpop.f32.mrb[1].mxu1 }
 0x468   :  { %v435_v50 = vadd.f32 %v3769_v46, %v430_v48 }
 0x46a   :  { %v437_v51 = vsel %vm436_vm3, %v435_v50, -inf }
 0x46b   :  { %438 = vmax.xlane.f32.xlu1 %v437_v51 }
 0x47c   :  { %448 = vrot.lane.b32.xlu1 %v3751_v36, %s3419_s4 }
 0x480   :  { %524 = vrot.lane.b32.xlu1 %v3751_v36, %s3418_s11 }
 0x4f8   :  { %v439_v52 = vpop.xlane.xlu1 %438 }
 0x4f9   :  { %v440_v53 = vsub.f32 %v435_v50, %v439_v52  ;;  %v2987_v52 = vld [vmem:[%s4071_s6] sm:$0xff]  }
 0x4fb   :  { %v441_v54 = vmul.f32 1.442695, %v440_v53  ;;  %v2988_v53 = vld [vmem:[%s4071_s6 + $0x8] sm:$0xff]  }
 0x4fc   :  { %v449_v55 = vpop.permute.xlu1 %448 }
 0x4fd   :  { %3013 = vpow2.f32 %v441_v54  ;;  %2796 = vmatpush3.msra.mxu1 %v449_v55 }
 0x4fe   :  { %2800 = vmatprep.subr.mxu1 %v3414_v15 }
 0x500   :  { %v525_v58 = vpop.permute.xlu1 %524 }
 0x507   :  { %v3014_v56 = vpop.eup %3013 }
 0x508   :  { %v443_v57 = vsel %vm436_vm3, %v3014_v56, 0.0 }
 0x509   :  { %444 = vadd.xlane.f32.xlu1 %v443_v57 }
 0x51a   :  { %868 = vrot.lane.b32.xlu1 %v3757_v40, %s3417_s13 }
 0x596   :  { %v445_v59 = vpop.xlane.xlu1 %444 }
 0x597   :  { %3015 = vrcp.f32 %v445_v59 }
 0x59a   :  { %v869_v0 = vpop.permute.xlu1 %868 }
 0x5a1   :  { %v3016_v60 = vpop.eup %3015 }
 0x5a2   :  { %v447_v62 = vmul.f32 %v3016_v60, %v3014_v56 }
 0x5a4   :  { %2798 = vmatmul.mubr.msk.f32.vlgmr.msra.gmra.mrb[2].mxu1 %vm436_vm3, %v447_v62 }
 0x5a5   :  { %2801 = vmatpush3.xpose.msk.msra.mxu1 %vm355_vm2, %v527_v61  ;;  %2802 = vmatprep.mubr.msk.f32.mxu1 %vm3415_vm1, %v3414_v15 }
 0x5a6   :  { %2810 = vmatprep.subr.mxu1 %v3414_v15 }
 0x5a8   :  { %2803 = vmatmul.mubr.msk.f32.vlgmr.msra.gmra.mrb[4].mxu1 %vm355_vm2, %v525_v58 }
 0x5a9   :  { %2811 = vmatpush3.xpose.msk.msra.mxu1 %vm355_vm2, %v698_v63  ;;  %2812 = vmatprep.mubr.msk.f32.mxu1 %vm3415_vm1, %v3414_v15 }
 0x5aa   :  { %2820 = vmatprep.subr.mxu1 %v3414_v15 }
 0x5ac   :  { %2813 = vmatmul.mubr.msk.f32.vlgmr.msra.gmra.mrb[6].mxu1 %vm355_vm2, %v3757_v40 }
 0x5ad   :  { %2821 = vmatpush3.xpose.msk.msra.mxu1 %vm355_vm2, %v869_v0  ;;  %2822 = vmatprep.mubr.msk.f32.mxu1 %vm3415_vm1, %v3414_v15 }
 0x5ae   :  { %2830 = vmatprep.subr.bf16.mxu1 %v3414_v15 }
 0x5b0   :  { %2823 = vmatmul.mubr.msk.f32.vlgmr.msra.gmra.mrb[8].mxu1 %vm355_vm2, %v867_v1 }
 0x5b1   :  { %2834 = vmatprep.mubr.msk.bf16.mxu1 %vm3415_vm1, %v3414_v15  ;;  %2831 = vmatpush3.bf16.msra.mxu1 %v2987_v52 }
 0x5b2   :  { %2832 = vmatprep.subr.bf16.mxu1 %v3414_v15 }
 0x5b5   :  { %2833 = vmatpush3.bf16.msra.mxu1 %v2988_v53 }
 0x5b6   :  { %2846 = vmatprep.subr.bf16.mxu1 %v3414_v15 }
 0x677   :  { %v3800_v2 = vpop.f32.mrb[2].mxu1 }
 0x678   :  { %v2799_v3 = vpop.f32.mrb[3].mxu1 }
 0x67b   :  { %v598_v5 = vpop.f32.mrb[4].mxu1 }
 0x67c   :  { %v602_v6 = vmul.f32 0.25, %v598_v5  ;;  %v2804_v7 = vpop.f32.mrb[5].mxu1 }
 0x67e   :  { %v603_v8 = vadd.f32 %v602_v6, %v3769_v46 }
 0x67f   :  { %v769_v10 = vpop.f32.mrb[6].mxu1 }
 0x680   :  { %v773_v11 = vmul.f32 0.25, %v769_v10  ;;  %v2814_v12 = vpop.f32.mrb[7].mxu1  ;;  %v604_v13 = vsel %vm436_vm3, %v603_v8, -inf }
 0x681   :  { %605 = vmax.xlane.f32.xlu1 %v604_v13 }
 0x682   :  { %v778_v14 = vadd.f32 %v3803_v9, %v773_v11 }
 0x683   :  { %v940_v16 = vpop.f32.mrb[8].mxu1 }
 0x684   :  { %v944_v17 = vmul.f32 0.25, %v940_v16  ;;  %v2824_v18 = vpop.f32.mrb[9].mxu1  ;;  %v779_v19 = vsel %vm436_vm3, %v778_v14, -inf }
 0x685   :  { %780 = vmax.xlane.f32.xlu0 %v779_v19 }
 0x686   :  { %v945_v20 = vadd.f32 %v944_v17, %v3803_v9 }
 0x688   :  { %v946_v21 = vsel %vm436_vm3, %v945_v20, -inf }
 0x689   :  { %947 = vmax.xlane.f32.xlu0 %v946_v21 }
 0x692   :  { %615 = vrot.lane.b32.xlu1 %v3751_v36, %s3420_s29 }
 0x70e   :  { %v606_v22 = vpop.xlane.xlu1 %605 }
 0x70f   :  { %v607_v23 = vsub.f32 %v603_v8, %v606_v22 }
 0x711   :  { %v608_v24 = vmul.f32 1.442695, %v607_v23 }
 0x712   :  { %v781_v25 = vpop.xlane.xlu0 %780  ;;  %v616_v26 = vpop.permute.xlu1 %615 }
 0x713   :  { %3017 = vpow2.f32 %v608_v24  ;;  %v782_v27 = vsub.f32 %v778_v14, %v781_v25  ;;  %2806 = vmatpush3.msra.mxu0 %v616_v26  ;;  %v2990_v25 = vld [vmem:[%s4075_s10 + $0x8] sm:$0xff]  }
 0x714   :  { %2815 = vmatprep.subr.mxu0 %v3414_v15 }
 0x715   :  { %v783_v28 = vmul.f32 1.442695, %v782_v27 }
 0x716   :  { %v948_v29 = vpop.xlane.xlu0 %947 }
 0x717   :  { %3019 = vpow2.f32 %v783_v28  ;;  %v949_v30 = vsub.f32 %v945_v20, %v948_v29 }
 0x719   :  { %v950_v33 = vmul.f32 1.442695, %v949_v30 }
 0x71b   :  { %3021 = vpow2.f32 %v950_v33 }
 0x71d   :  { %v3018_v34 = vpop.eup %3017 }
 0x71e   :  { %v610_v35 = vsel %vm436_vm3, %v3018_v34, 0.0 }
 0x71f   :  { %611 = vadd.xlane.f32.xlu0 %v610_v35 }
 0x721   :  { %v3020_v36 = vpop.eup %3019 }
 0x722   :  { %v785_v37 = vsel %vm436_vm3, %v3020_v36, 0.0 }
 0x723   :  { %786 = vadd.xlane.f32.xlu1 %v785_v37 }
 0x725   :  { %v3022_v38 = vpop.eup %3021 }
 0x726   :  { %v952_v39 = vsel %vm436_vm3, %v3022_v38, 0.0 }
 0x727   :  { %953 = vadd.xlane.f32.xlu0 %v952_v39 }
 0x734   :  { %957 = vrot.lane.b32.xlu1 %v3757_v40, %s3420_s29 }
 0x73d   :  { %790 = vrot.lane.b32.xlu0 %v3757_v40, %s3419_s4 }
 0x7ac   :  { %v612_v41 = vpop.xlane.xlu0 %611 }
 0x7ad   :  { %3023 = vrcp.f32 %v612_v41  ;;  %v2641_v41 = vld [vmem:[#allocation14] ss:$0 sm:$0xff] }
 0x7b0   :  { %v787_v42 = vpop.xlane.xlu1 %786 }
 0x7b1   :  { %3025 = vrcp.f32 %v787_v42 }
 0x7b4   :  { %v954_v43 = vpop.xlane.xlu0 %953  ;;  %v958_v40 = vpop.permute.xlu1 %957 }
 0x7b5   :  { %3027 = vrcp.f32 %v954_v43 }
 0x7b7   :  { %v3024_v44 = vpop.eup %3023 }
 0x7b8   :  { %v614_v45 = vmul.f32 %v3024_v44, %v3018_v34  ;;  %v791_v47 = vpop.permute.xlu0 %790 }
 0x7ba   :  { %2808 = vmatmul.mubr.msk.f32.vlgmr.msra.gmra.mrb[4].mxu0 %vm436_vm3, %v614_v45 }
 0x7bb   :  { %v3026_v48 = vpop.eup %3025  ;;  %2816 = vmatpush3.msra.mxu0 %v791_v47  ;;  %2817 = vmatprep.mubr.msk.f32.mxu0 %vm3415_vm1, %v3414_v15  ;;  %v2991_v47 = vld [vmem:[%s4077_s12] sm:$0xff]  }
 0x7bc   :  { %v789_v49 = vmul.f32 %v3026_v48, %v3020_v36  ;;  %2825 = vmatprep.subr.mxu0 %v3414_v15  ;;  %v2640_v36 = vld [vmem:[#allocation13] ss:$0 sm:$0xff]  ;;  %v2992_v48 = vld [vmem:[%s4077_s12 + $0x8] sm:$0xff]  }
 0x7be   :  { %2818 = vmatmul.mubr.msk.f32.vlgmr.msra.gmra.mrb[6].mxu0 %vm436_vm3, %v789_v49  ;;  %v2993_v49 = vld [vmem:[%s4077_s12 + $0x10] sm:$0xff]  }
 0x7bf   :  { %v3028_v50 = vpop.eup %3027  ;;  %2826 = vmatpush3.msra.mxu0 %v958_v40  ;;  %2827 = vmatprep.mubr.msk.f32.mxu0 %vm3415_vm1, %v3414_v15  ;;  %v2994_v40 = vld [vmem:[%s4077_s12 + $0x18] sm:$0xff]  }
 0x7c0   :  { %v956_v51 = vmul.f32 %v3028_v50, %v3022_v38  ;;  %2838 = vmatprep.subr.bf16.mxu0 %v3414_v15  ;;  %v2642_v50 = vld [vmem:[#allocation16] ss:$0 sm:$0xff] }
 0x7c2   :  { %2828 = vmatmul.mubr.msk.f32.vlgmr.msra.gmra.mrb[8].mxu0 %vm436_vm3, %v956_v51 }
 0x7c3   :  { %2842 = vmatprep.mubr.msk.bf16.mxu0 %vm3415_vm1, %v3414_v15 }
 0x88d   :  { %v687_v54 = vpop.f32.mrb[4].mxu0 }
 0x88e   :  { %v2809_v55 = vpop.f32.mrb[5].mxu0 }
 0x891   :  { %v862_v56 = vpop.f32.mrb[6].mxu0 }
 0x892   :  { %v2819_v57 = vpop.f32.mrb[7].mxu0 }
 0x895   :  { %v1029_v58 = vpop.f32.mrb[8].mxu0 }
 0x896   :  { %v2975_v59 = vpack.i.bf16 %v1029_v58, %v687_v54  ;;  %v2829_v60 = vpop.f32.mrb[9].mxu0 }
 0x898   :  { %2976 = vrot.lane.b32.xlu1 %v2975_v59, %s4102_s3 }
 0x90a   :  { %v2977_v61 = vpop.permute.xlu1 %2976 }
 0x90b   :  { %v2979_v62 = vunpack.i.h.bf16 %v2977_v61  ;;  %v2978_v63 = vunpack.i.l.bf16 %v2977_v61 }
 0x90d   :  { %v1037_v0 = vsel %vm355_vm2, %v862_v56, %v2979_v62  ;;  %v695_v1 = vsel %vm355_vm2, %v3800_v2, %v2978_v63 }
 0x90e   :  { %v1038_v3 = vpack.c.bf16 %v1037_v0, %v695_v1 }
 0x910   :  { %2835 = vmatmul.mubr.msk.bf16.vlgmr.msra.gmra.mrb[12].mxu1 %vm240_vm0, %v1038_v3 }
 0x911   :  { %2854 = vmatprep.mubr.msk.bf16.mxu1 %vm3415_vm1, %v3414_v15  ;;  %2847 = vmatpush3.bf16.msra.mxu1 %v2991_v47 }
 0x912   :  { %2848 = vmatprep.subr.bf16.mxu1 %v3414_v15 }
 0x915   :  { %2849 = vmatpush3.bf16.msra.mxu1 %v2992_v48 }
 0x916   :  { %2850 = vmatprep.subr.bf16.mxu1 %v3414_v15 }
 0x919   :  { %2851 = vmatpush3.bf16.msra.mxu1 %v2993_v49 }
 0x91a   :  { %2852 = vmatprep.subr.bf16.mxu1 %v3414_v15 }
 0x91d   :  { %2853 = vmatpush3.bf16.msra.mxu1 %v2994_v40 }
 0x91e   :  { %2876 = vmatprep.subr.mxu1 %v3414_v15 }
 0x9e3   :  { %v1099_v5 = vpop.f32.mrb[12].mxu1 }
 0x9e4   :  { %v1100_v6 = vadd.f32 %v2636_v4, %v1099_v5  ;;  %v2836_v7 = vpop.f32.mrb[13].mxu1 }
 0x9e5   :  { %v1102_v8 = vpop.f32.mrb[14].mxu1 }
 0x9e6   :  { %v1103_v10 = vadd.f32 %v2636_v4, %v1102_v8  ;;  %v2837_v11 = vpop.f32.mrb[15].mxu1  ;;  %v1106_v12 = vadd.f32 %v1100_v6, %v3742_v31 }
 0x9e8   :  { %v1110_v13 = vsel %vm240_vm0, %v1106_v12, 0.0  ;;  %v1107_v14 = vadd.f32 %v1103_v10, %v3744_v32  ;;  %v2989_v32 = vld [vmem:[%s4075_s10] sm:$0xff]  }
 0x9e9   :  { %1111 = vadd.xlane.f32.xlu1 %v1110_v13  ;;  %2839 = vmatpush3.bf16.msra.mxu0 %v2989_v32 }
 0x9ea   :  { %v1113_v2 = vsel %vm240_vm0, %v1107_v14, 0.0  ;;  %2840 = vmatprep.subr.bf16.mxu0 %v3414_v15 }
 0x9eb   :  { %1114 = vadd.xlane.f32.xlu0 %v1113_v2 }
 0x9ed   :  { %2841 = vmatpush3.bf16.msra.mxu0 %v2990_v25 }
 0x9ee   :  { %2858 = vmatprep.subr.bf16.mxu0 %v3414_v15 }
 0xa76   :  { %v1112_v16 = vpop.xlane.xlu1 %1111 }
 0xa77   :  { %v1116_v17 = vmul.f32 0.03125, %v1112_v16 }
 0xa78   :  { %v1115_v18 = vpop.xlane.xlu0 %1114 }
 0xa79   :  { %v1118_v19 = vsub.f32 %v1106_v12, %v1116_v17  ;;  %v1117_v20 = vmul.f32 0.03125, %v1115_v18 }
 0xa7b   :  { %v1119_v21 = vsub.f32 %v1107_v14, %v1117_v20  ;;  %v1120_v22 = vmul.f32 %v1118_v19, %v1118_v19  ;;  %v2646_v14 = vld [vmem:[#allocation17] ss:$0 sm:$0xff] }
 0xa7d   :  { %v1122_v23 = vsel %vm240_vm0, %v1120_v22, 0.0  ;;  %v1121_v24 = vmul.f32 %v1119_v21, %v1119_v21 }
 0xa7e   :  { %1123 = vadd.xlane.f32.xlu0 %v1122_v23 }
 0xa7f   :  { %v1125_v31 = vsel %vm240_vm0, %v1121_v24, 0.0 }
 0xa82   :  { %1126 = vadd.xlane.f32.xlu0 %v1125_v31 }
 0xb0b   :  { %v1124_v26 = vpop.xlane.xlu0 %1123 }
 0xb0c   :  { %v1128_v27 = vmul.f32 0.03125, %v1124_v26 }
 0xb0e   :  { %v1130_v28 = vadd.f32 1e-12, %v1128_v27 }
 0xb0f   :  { %v1127_v29 = vpop.xlane.xlu0 %1126 }
 0xb10   :  { %3029 = vrsqrt.f32 %v1130_v28  ;;  %v1129_v30 = vmul.f32 0.03125, %v1127_v29 }
 0xb12   :  { %v1131_v33 = vadd.f32 1e-12, %v1129_v30 }
 0xb14   :  { %3031 = vrsqrt.f32 %v1131_v33 }
 0xb1a   :  { %v3030_v34 = vpop.eup %3029 }
 0xb1b   :  { %v1134_v35 = vmul.f32 %v3030_v34, %v1118_v19 }
 0xb1d   :  { %v1142_v38 = vmul.f32 %v2640_v36, %v1134_v35  ;;  %v2995_v35 = vld [vmem:[%s4103_s5 + $0x10] sm:$0xff]  }
 0xb1e   :  { %v3032_v37 = vpop.eup %3031 }
 0xb1f   :  { %v1135_v39 = vmul.f32 %v3032_v37, %v1119_v21  ;;  %v1150_v43 = vadd.f32 %v2641_v41, %v1142_v38 }
 0xb21   :  { %v1143_v42 = vmul.f32 %v2640_v36, %v1135_v39  ;;  %v2996_v36 = vld [vmem:[%s4103_s5 + $0x18] sm:$0xff]  }
 0xb23   :  { %v1151_v44 = vadd.f32 %v2641_v41, %v1143_v42 }
 0xb25   :  { %v1152_v45 = vpack.c.bf16 %v1151_v44, %v1150_v43 }
 0xb27   :  { %2843 = vmatmul.mubr.msk.bf16.vlgmr.msra.gmra.mrb[12].mxu0 %vm240_vm0, %v1152_v45  ;;  %v2652_v45 = vld [vmem:[#allocation19] ss:$0 sm:$0xff] }
 0xb28   :  { %2862 = vmatprep.mubr.msk.bf16.mxu0 %vm3415_vm1, %v3414_v15  ;;  %2859 = vmatpush3.bf16.msra.mxu0 %v2995_v35 }
 0xb29   :  { %2860 = vmatprep.subr.bf16.mxu0 %v3414_v15 }
 0xb2c   :  { %2861 = vmatpush3.bf16.msra.mxu0 %v2996_v36 }
 0xb2d   :  { %2866 = vmatprep.subr.mxu0 %v3414_v15 }
 0xbfa   :  { %v1213_v51 = vpop.f32.mrb[12].mxu0 }
 0xbfb   :  { %v1214_v52 = vadd.f32 %v2642_v50, %v1213_v51  ;;  %v2844_v53 = vpop.f32.mrb[13].mxu0 }
 0xbfc   :  { %v1216_v54 = vpop.f32.mrb[14].mxu0 }
 0xbfd   :  { %v1222_v55 = vmul.f32 0.044715, %v1214_v52  ;;  %v1217_v56 = vadd.f32 %v2642_v50, %v1216_v54  ;;  %v2845_v57 = vpop.f32.mrb[15].mxu0  ;;  %v1220_v7 = vmul.f32 0.5, %v1214_v52  ;;  %v2653_v50 = vld [vmem:[#allocation20] ss:$0 sm:$0xff] }
 0xbff   :  { %v1224_v58 = vmul.f32 %v1222_v55, %v1214_v52  ;;  %v1223_v59 = vmul.f32 0.044715, %v1217_v56  ;;  %v1221_v8 = vmul.f32 0.5, %v1217_v56  ;;  %v2658_v55 = vld [vmem:[#allocation10 + $0x1] ss:$0 sm:$0xff] }
 0xc01   :  { %v1226_v60 = vmul.f32 %v1224_v58, %v1214_v52  ;;  %v1225_v61 = vmul.f32 %v1223_v59, %v1217_v56 }
 0xc03   :  { %v1228_v62 = vadd.f32 %v1226_v60, %v1214_v52  ;;  %v1227_v63 = vmul.f32 %v1225_v61, %v1217_v56 }
 0xc05   :  { %v1230_v0 = vmul.f32 0.7978846, %v1228_v62  ;;  %v1229_v1 = vadd.f32 %v1227_v63, %v1217_v56 }
 0xc07   :  { %3033 = vtanh.f32 %v1230_v0  ;;  %v1231_v3 = vmul.f32 0.7978846, %v1229_v1 }
 0xc09   :  { %3035 = vtanh.f32 %v1231_v3 }
 0xc11   :  { %v3034_v4 = vpop.eup %3033 }
 0xc12   :  { %v1234_v5 = vadd.f32 1.0, %v3034_v4 }
 0xc13   :  { %v3036_v6 = vpop.eup %3035 }
 0xc14   :  { %v1235_v10 = vadd.f32 1.0, %v3036_v6  ;;  %v1236_v11 = vmul.f32 %v1234_v5, %v1220_v7 }
 0xc16   :  { %v1237_v12 = vmul.f32 %v1235_v10, %v1221_v8 }
 0xc18   :  { %v1238_v13 = vpack.c.bf16 %v1237_v12, %v1236_v11 }
 0xc1a   :  { %2855 = vmatmul.mubr.msk.bf16.vlgmr.msra.gmra.mrb[16].mxu1 %vm1278_vm4, %v1238_v13 }
 0xc1b   :  { %2878 = vmatprep.mubr.msk.f32.mxu1 %vm3415_vm1, %v3414_v15 }
 0xced   :  { %v1316_v2 = vpop.f32.mrb[16].mxu1 }
 0xcee   :  { %v1317_v16 = vadd.f32 %v2646_v14, %v1316_v2  ;;  %v2856_v17 = vpop.f32.mrb[17].mxu1 }
 0xcef   :  { %v1319_v18 = vpop.f32.mrb[18].mxu1 }
 0xcf0   :  { %v1320_v19 = vadd.f32 %v2646_v14, %v1319_v18  ;;  %v2857_v20 = vpop.f32.mrb[19].mxu1  ;;  %v1323_v21 = vadd.f32 %v1317_v16, %v1150_v43 }
 0xcf2   :  { %v1327_v22 = vsel %vm240_vm0, %v1323_v21, 0.0  ;;  %v1324_v23 = vadd.f32 %v1320_v19, %v1151_v44 }
 0xcf3   :  { %1328 = vadd.xlane.f32.xlu1 %v1327_v22 }
 0xcf4   :  { %v1330_v24 = vsel %vm240_vm0, %v1324_v23, 0.0 }
 0xcf5   :  { %1331 = vadd.xlane.f32.xlu0 %v1330_v24 }
 0xd80   :  { %v1329_v31 = vpop.xlane.xlu1 %1328 }
 0xd81   :  { %v1333_v32 = vmul.f32 0.03125, %v1329_v31 }
 0xd82   :  { %v1332_v25 = vpop.xlane.xlu0 %1331 }
 0xd83   :  { %v1335_v26 = vsub.f32 %v1323_v21, %v1333_v32  ;;  %v1334_v27 = vmul.f32 0.03125, %v1332_v25 }
 0xd85   :  { %v1336_v28 = vsub.f32 %v1324_v23, %v1334_v27  ;;  %v1337_v29 = vmul.f32 %v1335_v26, %v1335_v26 }
 0xd87   :  { %v1339_v30 = vsel %vm240_vm0, %v1337_v29, 0.0  ;;  %v1338_v33 = vmul.f32 %v1336_v28, %v1336_v28 }
 0xd88   :  { %1340 = vadd.xlane.f32.xlu1 %v1339_v30 }
 0xd89   :  { %v1342_v34 = vsel %vm240_vm0, %v1338_v33, 0.0 }
 0xd8a   :  { %1343 = vadd.xlane.f32.xlu0 %v1342_v34 }
 0xe15   :  { %v1341_v37 = vpop.xlane.xlu1 %1340 }
 0xe16   :  { %v1345_v38 = vmul.f32 0.03125, %v1341_v37 }
 0xe17   :  { %v1344_v39 = vpop.xlane.xlu0 %1343 }
 0xe18   :  { %v1347_v41 = vadd.f32 1e-12, %v1345_v38  ;;  %v1346_v42 = vmul.f32 0.03125, %v1344_v39 }
 0xe1a   :  { %3037 = vrsqrt.f32 %v1347_v41  ;;  %v1348_v43 = vadd.f32 1e-12, %v1346_v42 }
 0xe1c   :  { %3039 = vrsqrt.f32 %v1348_v43 }
 0xe24   :  { %v3038_v44 = vpop.eup %3037 }
 0xe25   :  { %v1351_v47 = vmul.f32 %v3038_v44, %v1335_v26 }
 0xe26   :  { %v3040_v48 = vpop.eup %3039 }
 0xe27   :  { %v1359_v49 = vmul.f32 %v2652_v45, %v1351_v47  ;;  %v1352_v40 = vmul.f32 %v3040_v48, %v1336_v28 }
 0xe29   :  { %v1360_v51 = vmul.f32 %v2652_v45, %v1352_v40  ;;  %v3894_v52 = vadd.f32 %v2653_v50, %v1359_v49 }
 0xe2b   :  { %v3896_v53 = vadd.f32 %v2653_v50, %v1360_v51 }
 0xe2d   :  { %v1369_v54 = vpack.c.bf16 %v3896_v53, %v3894_v52 }
 0xe2f   :  { %2863 = vmatmul.mubr.msk.bf16.vlgmr.msra.gmra.mrb[16].mxu0 %vm240_vm0, %v1369_v54 }
 0xe30   :  { %2868 = vmatprep.mubr.msk.f32.mxu0 %vm3415_vm1, %v3414_v15 }
 0xf02   :  { %v1432_v56 = vpop.f32.mrb[16].mxu0 }
 0xf03   :  { %v3903_v57 = vadd.f32 %v2658_v55, %v1432_v56  ;;  %v2864_v58 = vpop.f32.mrb[17].mxu0 }
 0xf04   :  { %v1435_v59 = vpop.f32.mrb[18].mxu0 }
 0xf05   :  { %1607 = vrot.lane.b32.xlu0 %v3903_v57, %s3417_s13  ;;  %1440 = vrot.lane.b32.xlu1 %v3903_v57, %s3416_s26  ;;  %v2865_v60 = vpop.f32.mrb[19].mxu0  ;;  %v3909_v61 = vadd.f32 %v2658_v55, %v1435_v59 }
 0xf09   :  { %1605 = vrot.lane.b32.xlu1 %v3903_v57, %s3418_s11  ;;  %1943 = vrot.lane.b32.xlu0 %v3909_v61, %s3418_s11 }
 0xf0d   :  { %1778 = vrot.lane.b32.xlu1 %v3909_v61, %s3416_s26 }
 0xf11   :  { %1945 = vrot.lane.b32.xlu1 %v3909_v61, %s3417_s13 }
 0xf77   :  { %v1608_v62 = vpop.permute.xlu0 %1607  ;;  %v1441_v63 = vpop.permute.xlu1 %1440 }
 0xf78   :  { %2867 = vmatpush3.xpose.msk.msra.mxu0 %vm355_vm2, %v1441_v63  ;;  %2877 = vmatpush3.xpose.msk.msra.mxu1 %vm355_vm2, %v1608_v62  ;;  %v2997_v63 = vld [vmem:[%s4071_s6 + $0x10] sm:$0xff]  }
 0xf79   :  { %2886 = vmatprep.subr.mxu1 %v3414_v15  ;;  %2871 = vmatprep.subr.mxu0 %v3414_v15 }
 0xf7b   :  { %2869 = vmatmul.mubr.msk.f32.vlgmr.msra.gmra.mrb[10].mxu0 %vm355_vm2, %v3903_v57  ;;  %v1606_v0 = vpop.permute.xlu1 %1605  ;;  %v1944_v4 = vpop.permute.xlu0 %1943 }
 0xf7c   :  { %2879 = vmatmul.mubr.msk.f32.vlgmr.msra.gmra.mrb[10].mxu1 %vm355_vm2, %v1606_v0  ;;  %2873 = vmatprep.mubr.msk.f32.mxu0 %vm3415_vm1, %v3414_v15 }
 0xf7d   :  { %2888 = vmatprep.mubr.msk.f32.mxu1 %vm3415_vm1, %v3414_v15 }
 0xf7f   :  { %v1779_v1 = vpop.permute.xlu1 %1778 }
 0xf80   :  { %2887 = vmatpush3.xpose.msk.msra.mxu1 %vm355_vm2, %v1779_v1 }
 0xf81   :  { %2896 = vmatprep.subr.mxu1 %v3414_v15 }
 0xf83   :  { %2889 = vmatmul.mubr.msk.f32.vlgmr.msra.gmra.mrb[20].mxu1 %vm355_vm2, %v3909_v61  ;;  %v1946_v3 = vpop.permute.xlu1 %1945 }
 0xf84   :  { %2897 = vmatpush3.xpose.msk.msra.mxu1 %vm355_vm2, %v1946_v3  ;;  %2898 = vmatprep.mubr.msk.f32.mxu1 %vm3415_vm1, %v3414_v15  ;;  %v2998_v3 = vld [vmem:[%s4071_s6 + $0x18] sm:$0xff]  }
 0xf85   :  { %2906 = vmatprep.subr.bf16.mxu1 %v3414_v15 }
 0xf87   :  { %2899 = vmatmul.mubr.msk.f32.vlgmr.msra.gmra.mrb[22].mxu1 %vm355_vm2, %v1944_v4 }
 0xf88   :  { %2910 = vmatprep.mubr.msk.bf16.mxu1 %vm3415_vm1, %v3414_v15  ;;  %2907 = vmatpush3.bf16.msra.mxu1 %v2997_v63 }
 0xf89   :  { %2908 = vmatprep.subr.bf16.mxu1 %v3414_v15 }
 0xf8c   :  { %2909 = vmatpush3.bf16.msra.mxu1 %v2998_v3 }
 0xf8d   :  { %2922 = vmatprep.subr.bf16.mxu1 %v3414_v15 }
0x104e   :  { %v1512_v5 = vpop.f32.mrb[10].mxu0 }
0x104f   :  { %v1516_v6 = vmul.f32 0.25, %v1512_v5  ;;  %v2870_v7 = vpop.f32.mrb[11].mxu0  ;;  %v1679_v8 = vpop.f32.mrb[10].mxu1 }
0x1050   :  { %v1683_v10 = vmul.f32 0.25, %v1679_v8  ;;  %v2880_v11 = vpop.f32.mrb[11].mxu1 }
0x1051   :  { %v1517_v12 = vadd.f32 %v1516_v6, %v3769_v46 }
0x1052   :  { %v1684_v13 = vadd.f32 %v1683_v10, %v3769_v46 }
0x1053   :  { %v1518_v14 = vsel %vm436_vm3, %v1517_v12, -inf }
0x1054   :  { %1519 = vmax.xlane.f32.xlu1 %v1518_v14  ;;  %v1685_v2 = vsel %vm436_vm3, %v1684_v13, -inf }
0x1055   :  { %1686 = vmax.xlane.f32.xlu0 %v1685_v2 }
0x1056   :  { %v1850_v16 = vpop.f32.mrb[20].mxu1 }
0x1057   :  { %v1854_v17 = vmul.f32 0.25, %v1850_v16  ;;  %v2890_v18 = vpop.f32.mrb[21].mxu1 }
0x1058   :  { %v2678_v18 = vld [vmem:[#allocation11 + $0x1] ss:$0 sm:$0xff] }
0x1059   :  { %v1855_v19 = vadd.f32 %v1854_v17, %v3803_v9 }
0x105a   :  { %v2017_v20 = vpop.f32.mrb[22].mxu1 }
0x105b   :  { %v2021_v21 = vmul.f32 0.25, %v2017_v20  ;;  %v2900_v22 = vpop.f32.mrb[23].mxu1  ;;  %v1856_v23 = vsel %vm436_vm3, %v1855_v19, -inf }
0x105c   :  { %1857 = vmax.xlane.f32.xlu0 %v1856_v23 }
0x105d   :  { %v2022_v24 = vadd.f32 %v2021_v21, %v3803_v9 }
0x105f   :  { %v2023_v46 = vsel %vm436_vm3, %v2022_v24, -inf }
0x1060   :  { %2024 = vmax.xlane.f32.xlu0 %v2023_v46 }
0x1065   :  { %1529 = vrot.lane.b32.xlu1 %v3903_v57, %s3419_s4 }
0x10e1   :  { %v1520_v31 = vpop.xlane.xlu1 %1519 }
0x10e2   :  { %v1521_v32 = vsub.f32 %v1517_v12, %v1520_v31  ;;  %v1687_v25 = vpop.xlane.xlu0 %1686 }
0x10e3   :  { %v1688_v26 = vsub.f32 %v1684_v13, %v1687_v25 }
0x10e4   :  { %v1522_v27 = vmul.f32 1.442695, %v1521_v32 }
0x10e5   :  { %v1689_v28 = vmul.f32 1.442695, %v1688_v26  ;;  %v1530_v29 = vpop.permute.xlu1 %1529 }
0x10e6   :  { %3041 = vpow2.f32 %v1522_v27  ;;  %2872 = vmatpush3.msra.mxu0 %v1530_v29 }
0x10e7   :  { %3043 = vpow2.f32 %v1689_v28  ;;  %2881 = vmatprep.subr.mxu0 %v3414_v15 }
0x10e9   :  { %v1858_v30 = vpop.xlane.xlu0 %1857 }
0x10ea   :  { %v1859_v9 = vsub.f32 %v1855_v19, %v1858_v30 }
0x10ec   :  { %v1860_v33 = vmul.f32 1.442695, %v1859_v9 }
0x10ed   :  { %v2025_v34 = vpop.xlane.xlu0 %2024 }
0x10ee   :  { %3045 = vpow2.f32 %v1860_v33  ;;  %v2026_v35 = vsub.f32 %v2022_v24, %v2025_v34 }
0x10f0   :  { %v3042_v36 = vpop.eup %3041  ;;  %v2027_v37 = vmul.f32 1.442695, %v2026_v35 }
0x10f1   :  { %v3044_v38 = vpop.eup %3043  ;;  %v1524_v39 = vsel %vm436_vm3, %v3042_v36, 0.0 }
0x10f2   :  { %3047 = vpow2.f32 %v2027_v37  ;;  %1525 = vadd.xlane.f32.xlu1 %v1524_v39  ;;  %v1691_v41 = vsel %vm436_vm3, %v3044_v38, 0.0 }
0x10f3   :  { %1692 = vadd.xlane.f32.xlu0 %v1691_v41 }
0x10f8   :  { %v3046_v42 = vpop.eup %3045 }
0x10f9   :  { %v1862_v43 = vsel %vm436_vm3, %v3046_v42, 0.0 }
0x10fa   :  { %1863 = vadd.xlane.f32.xlu1 %v1862_v43 }
0x10fc   :  { %v3048_v44 = vpop.eup %3047 }
0x10fd   :  { %v2029_v45 = vsel %vm436_vm3, %v3048_v44, 0.0 }
0x10fe   :  { %2030 = vadd.xlane.f32.xlu0 %v2029_v45 }
0x110b   :  { %1867 = vrot.lane.b32.xlu1 %v3909_v61, %s3419_s4 }
0x110f   :  { %2034 = vrot.lane.b32.xlu1 %v3909_v61, %s3420_s29 }
0x1114   :  { %1696 = vrot.lane.b32.xlu0 %v3903_v57, %s3420_s29 }
0x117f   :  { %v1526_v47 = vpop.xlane.xlu1 %1525 }
0x1180   :  { %3049 = vrcp.f32 %v1526_v47  ;;  %v1693_v48 = vpop.xlane.xlu0 %1692  ;;  %v2682_v47 = vld [vmem:[#allocation13 + $0x1] ss:$0 sm:$0xff] }
0x1181   :  { %3051 = vrcp.f32 %v1693_v48 }
0x1187   :  { %v1864_v49 = vpop.xlane.xlu1 %1863 }
0x1188   :  { %3053 = vrcp.f32 %v1864_v49 }
0x118a   :  { %v3050_v40 = vpop.eup %3049 }
0x118b   :  { %v1528_v50 = vmul.f32 %v3050_v40, %v3042_v36  ;;  %v2031_v51 = vpop.xlane.xlu0 %2030  ;;  %v3052_v54 = vpop.eup %3051  ;;  %v3000_v36 = vld [vmem:[%s4075_s10 + $0x18] sm:$0xff]  }
0x118c   :  { %3055 = vrcp.f32 %v2031_v51  ;;  %v1695_v55 = vmul.f32 %v3052_v54, %v3044_v38  ;;  %v1868_v56 = vpop.permute.xlu1 %1867 }
0x118d   :  { %2874 = vmatmul.mubr.msk.f32.vlgmr.msra.gmra.mrb[20].mxu0 %vm436_vm3, %v1528_v50  ;;  %v2683_v50 = vld [vmem:[#allocation14 + $0x1] ss:$0 sm:$0xff] }
0x118e   :  { %2883 = vmatprep.mubr.msk.f32.mxu0 %vm3415_vm1, %v3414_v15 }
0x118f   :  { %v1697_v58 = vpop.permute.xlu0 %1696 }
0x1190   :  { %2882 = vmatpush3.msra.mxu0 %v1697_v58  ;;  %v2035_v60 = vpop.permute.xlu1 %2034  ;;  %v3001_v58 = vld [vmem:[%s4077_s12 + $0x20] sm:$0xff]  }
0x1191   :  { %2884 = vmatmul.mubr.msk.f32.vlgmr.msra.gmra.mrb[22].mxu0 %vm436_vm3, %v1695_v55  ;;  %2891 = vmatprep.subr.mxu0 %v3414_v15 }
0x1192   :  { %v3054_v57 = vpop.eup %3053  ;;  %2892 = vmatpush3.msra.mxu0 %v1868_v56  ;;  %2893 = vmatprep.mubr.msk.f32.mxu0 %vm3415_vm1, %v3414_v15 }
0x1193   :  { %v1866_v59 = vmul.f32 %v3054_v57, %v3046_v42  ;;  %2901 = vmatprep.subr.mxu0 %v3414_v15  ;;  %v3002_v57 = vld [vmem:[%s4077_s12 + $0x28] sm:$0xff]  }
0x1195   :  { %2894 = vmatmul.mubr.msk.f32.vlgmr.msra.gmra.mrb[24].mxu0 %vm436_vm3, %v1866_v59  ;;  %v3003_v59 = vld [vmem:[%s4077_s12 + $0x30] sm:$0xff]  }
0x1196   :  { %v3056_v61 = vpop.eup %3055  ;;  %2902 = vmatpush3.msra.mxu0 %v2035_v60  ;;  %2903 = vmatprep.mubr.msk.f32.mxu0 %vm3415_vm1, %v3414_v15  ;;  %v3004_v60 = vld [vmem:[%s4077_s12 + $0x38] sm:$0xff]  }
0x1197   :  { %v2033_v62 = vmul.f32 %v3056_v61, %v3048_v44  ;;  %2914 = vmatprep.subr.bf16.mxu0 %v3414_v15  ;;  %v2688_v61 = vld [vmem:[#allocation16 + $0x1] ss:$0 sm:$0xff] }
0x1199   :  { %2904 = vmatmul.mubr.msk.f32.vlgmr.msra.gmra.mrb[26].mxu0 %vm436_vm3, %v2033_v62 }
0x119a   :  { %2918 = vmatprep.mubr.msk.bf16.mxu0 %vm3415_vm1, %v3414_v15 }
0x1260   :  { %v1601_v0 = vpop.f32.mrb[20].mxu0 }
0x1261   :  { %v2875_v1 = vpop.f32.mrb[21].mxu0 }
0x1264   :  { %v1768_v4 = vpop.f32.mrb[22].mxu0 }
0x1265   :  { %v2885_v5 = vpop.f32.mrb[23].mxu0 }
0x1268   :  { %v1939_v6 = vpop.f32.mrb[24].mxu0 }
0x1269   :  { %v2895_v7 = vpop.f32.mrb[25].mxu0 }
0x126c   :  { %v2106_v8 = vpop.f32.mrb[26].mxu0 }
0x126d   :  { %v2980_v10 = vpack.i.bf16 %v2106_v8, %v1768_v4  ;;  %v2905_v11 = vpop.f32.mrb[27].mxu0 }
0x126f   :  { %2981 = vrot.lane.b32.xlu1 %v2980_v10, %s4102_s3 }
0x12e1   :  { %v2982_v12 = vpop.permute.xlu1 %2981 }
0x12e2   :  { %v2984_v13 = vunpack.i.h.bf16 %v2982_v12  ;;  %v2983_v14 = vunpack.i.l.bf16 %v2982_v12 }
0x12e4   :  { %v2114_v2 = vsel %vm355_vm2, %v1939_v6, %v2984_v13  ;;  %v1776_v16 = vsel %vm355_vm2, %v1601_v0, %v2983_v14 }
0x12e5   :  { %v2115_v17 = vpack.c.bf16 %v2114_v2, %v1776_v16 }
0x12e7   :  { %2911 = vmatmul.mubr.msk.bf16.vlgmr.msra.gmra.mrb[24].mxu1 %vm240_vm0, %v2115_v17 }
0x12e8   :  { %2930 = vmatprep.mubr.msk.bf16.mxu1 %vm3415_vm1, %v3414_v15  ;;  %2923 = vmatpush3.bf16.msra.mxu1 %v3001_v58 }
0x12e9   :  { %2924 = vmatprep.subr.bf16.mxu1 %v3414_v15 }
0x12ec   :  { %2925 = vmatpush3.bf16.msra.mxu1 %v3002_v57 }
0x12ed   :  { %2926 = vmatprep.subr.bf16.mxu1 %v3414_v15 }
0x12f0   :  { %2927 = vmatpush3.bf16.msra.mxu1 %v3003_v59  ;;  %v2707_v59 = vld [vmem:[#allocation20 + $0x1] ss:$0 sm:$0xff] }
0x12f1   :  { %2928 = vmatprep.subr.bf16.mxu1 %v3414_v15 }
0x12f4   :  { %2929 = vmatpush3.bf16.msra.mxu1 %v3004_v60 }
0x13ba   :  { %v2178_v19 = vpop.f32.mrb[24].mxu1 }
0x13bb   :  { %v2179_v20 = vadd.f32 %v2678_v18, %v2178_v19  ;;  %v2912_v21 = vpop.f32.mrb[25].mxu1 }
0x13bc   :  { %v2181_v22 = vpop.f32.mrb[26].mxu1 }
0x13bd   :  { %v2182_v23 = vadd.f32 %v2678_v18, %v2181_v22  ;;  %v2913_v24 = vpop.f32.mrb[27].mxu1  ;;  %v2185_v46 = vadd.f32 %v2179_v20, %v3894_v52 }
0x13bf   :  { %v2191_v31 = vsel %vm240_vm0, %v2185_v46, 0.0  ;;  %v2186_v32 = vadd.f32 %v2182_v23, %v3896_v53  ;;  %v2999_v53 = vld [vmem:[%s4075_s10 + $0x10] sm:$0xff]  }
0x13c0   :  { %2192 = vadd.xlane.f32.xlu0 %v2191_v31  ;;  %2915 = vmatpush3.bf16.msra.mxu0 %v2999_v53 }
0x13c1   :  { %v2194_v25 = vsel %vm240_vm0, %v2186_v32, 0.0  ;;  %2916 = vmatprep.subr.bf16.mxu0 %v3414_v15 }
0x13c2   :  { %2195 = vadd.xlane.f32.xlu1 %v2194_v25 }
0x13c4   :  { %2917 = vmatpush3.bf16.msra.mxu0 %v3000_v36 }
0x13c5   :  { %2934 = vmatprep.subr.bf16.mxu0 %v3414_v15 }
0x144d   :  { %v2193_v26 = vpop.xlane.xlu0 %2192 }
0x144e   :  { %v2197_v27 = vmul.f32 0.03125, %v2193_v26 }
0x144f   :  { %v2196_v28 = vpop.xlane.xlu1 %2195 }
0x1450   :  { %v2199_v29 = vsub.f32 %v2185_v46, %v2197_v27  ;;  %v2198_v30 = vmul.f32 0.03125, %v2196_v28  ;;  %v2700_v46 = vld [vmem:[#allocation17 + $0x1] ss:$0 sm:$0xff] }
0x1452   :  { %v2200_v9 = vsub.f32 %v2186_v32, %v2198_v30  ;;  %v2201_v33 = vmul.f32 %v2199_v29, %v2199_v29 }
0x1454   :  { %v2203_v34 = vsel %vm240_vm0, %v2201_v33, 0.0  ;;  %v2202_v35 = vmul.f32 %v2200_v9, %v2200_v9 }
0x1455   :  { %2204 = vadd.xlane.f32.xlu0 %v2203_v34 }
0x1456   :  { %v2206_v52 = vsel %vm240_vm0, %v2202_v35, 0.0 }
0x1459   :  { %2207 = vadd.xlane.f32.xlu0 %v2206_v52 }
0x14e2   :  { %v2205_v37 = vpop.xlane.xlu0 %2204 }
0x14e3   :  { %v2209_v38 = vmul.f32 0.03125, %v2205_v37 }
0x14e5   :  { %v2211_v39 = vadd.f32 1e-12, %v2209_v38 }
0x14e6   :  { %v2208_v41 = vpop.xlane.xlu0 %2207 }
0x14e7   :  { %3057 = vrsqrt.f32 %v2211_v39  ;;  %v2210_v42 = vmul.f32 0.03125, %v2208_v41 }
0x14e9   :  { %v2212_v43 = vadd.f32 1e-12, %v2210_v42 }
0x14eb   :  { %3059 = vrsqrt.f32 %v2212_v43  ;;  %v3005_v43 = vld [vmem:[%s4081_s16] sm:$0xff]  }
0x14f1   :  { %v3058_v44 = vpop.eup %3057 }
0x14f2   :  { %v2215_v45 = vmul.f32 %v3058_v44, %v2199_v29  ;;  %v3006_v44 = vld [vmem:[%s4081_s16 + $0x8] sm:$0xff]  }
0x14f4   :  { %v2223_v49 = vmul.f32 %v2682_v47, %v2215_v45 }
0x14f5   :  { %v3060_v48 = vpop.eup %3059 }
0x14f6   :  { %v2216_v40 = vmul.f32 %v3060_v48, %v2200_v9  ;;  %v2231_v54 = vadd.f32 %v2683_v50, %v2223_v49 }
0x14f8   :  { %v2224_v51 = vmul.f32 %v2682_v47, %v2216_v40 }
0x14fa   :  { %v2232_v55 = vadd.f32 %v2683_v50, %v2224_v51 }
0x14fc   :  { %v2233_v56 = vpack.c.bf16 %v2232_v55, %v2231_v54 }
0x14fe   :  { %2919 = vmatmul.mubr.msk.bf16.vlgmr.msra.gmra.mrb[28].mxu0 %vm240_vm0, %v2233_v56 }
0x14ff   :  { %2938 = vmatprep.mubr.msk.bf16.mxu0 %vm3415_vm1, %v3414_v15  ;;  %2935 = vmatpush3.bf16.msra.mxu0 %v3005_v43 }
0x1500   :  { %2936 = vmatprep.subr.bf16.mxu0 %v3414_v15 }
0x1503   :  { %2937 = vmatpush3.bf16.msra.mxu0 %v3006_v44 }
0x1504   :  { %2942 = vmatprep.subr.bf16.mxu0 %v3414_v15 }
0x15d1   :  { %v2296_v62 = vpop.f32.mrb[28].mxu0 }
0x15d2   :  { %v2297_v63 = vadd.f32 %v2688_v61, %v2296_v62  ;;  %v2920_v0 = vpop.f32.mrb[29].mxu0 }
0x15d3   :  { %v2299_v1 = vpop.f32.mrb[30].mxu0  ;;  %v3007_v0 = vld [vmem:[%s4083_s18] sm:$0xff]  }
0x15d4   :  { %v2305_v3 = vmul.f32 0.044715, %v2297_v63  ;;  %v2300_v4 = vadd.f32 %v2688_v61, %v2299_v1  ;;  %v2921_v5 = vpop.f32.mrb[31].mxu0  ;;  %v2303_v19 = vmul.f32 0.5, %v2297_v63  ;;  %v3008_v1 = vld [vmem:[%s4083_s18 + $0x8] sm:$0xff]   ;;  %s3421_s18 = smov [#allocation23]  }
0x15d5   :  { %s2600_s5 = sshll.u32 %s3421_s18, 4  ;;  %s2601_s5 = int_to_ptr.vmem [resolvable:$true] %s2600_s5 }
0x15d6   :  { %v2307_v6 = vmul.f32 %v2305_v3, %v2297_v63  ;;  %v2306_v7 = vmul.f32 0.044715, %v2300_v4  ;;  %v2304_v20 = vmul.f32 0.5, %v2300_v4  ;;  %v2708_v3 = vld [vmem:[#allocation22] ss:$0 sm:$0xff]  ;;  %s3359_s26 = scalar_lea.vmem %s2601_s5, 256  ;;  %p3364_p7 = scmp.lt.s32.totalorder %s2601_s5, %s2601_s5 }
0x15d7   :  { %p3360_p6 = scmp.ne.s32.totalorder %s2601_s5, %s3359_s26  ;;  %p3365_p8 = scmp.lt.s32.totalorder %s3359_s26, %s3359_s26 }
0x15d8   :  { %v2309_v8 = vmul.f32 %v2307_v6, %v2297_v63  ;;  %v2308_v10 = vmul.f32 %v2306_v7, %v2300_v4 }
0x15d9   :  { %p3366_p9 = por %p3365_p8, %p3364_p7 }
0x15da   :  { %v2311_v11 = vadd.f32 %v2309_v8, %v2297_v63  ;;  %v2310_v12 = vmul.f32 %v2308_v10, %v2300_v4 }
0x15db   :  { %p3367_p10 = pnand %p3366_p9, %p3360_p6 }
0x15dc   :  { %v2313_v13 = vmul.f32 0.7978846, %v2311_v11  ;;  %v2312_v14 = vadd.f32 %v2310_v12, %v2300_v4 }
0x15de   :  { %3061 = vtanh.f32 %v2313_v13  ;;  %v2314_v2 = vmul.f32 0.7978846, %v2312_v14  ;;  %v2712_v14 = vld [vmem:[%s4084_s19] ss:$0 sm:$0xff] }
0x15e0   :  { %3063 = vtanh.f32 %v2314_v2 }
0x15e8   :  { %v3062_v16 = vpop.eup %3061 }
0x15e9   :  { %v2317_v17 = vadd.f32 1.0, %v3062_v16 }
0x15ea   :  { %v3064_v18 = vpop.eup %3063 }
0x15eb   :  { %v2318_v21 = vadd.f32 1.0, %v3064_v18  ;;  %v2319_v22 = vmul.f32 %v2317_v17, %v2303_v19 }
0x15ed   :  { %v2320_v23 = vmul.f32 %v2318_v21, %v2304_v20 }
0x15ef   :  { %v2321_v24 = vpack.c.bf16 %v2320_v23, %v2319_v22 }
0x15f1   :  { %2931 = vmatmul.mubr.msk.bf16.vlgmr.msra.gmra.mrb[28].mxu1 %vm1278_vm4, %v2321_v24 }
0x16c4   :  { %v2400_v31 = vpop.f32.mrb[28].mxu1 }
0x16c5   :  { %v2401_v32 = vadd.f32 %v2700_v46, %v2400_v31  ;;  %v2932_v25 = vpop.f32.mrb[29].mxu1 }
0x16c6   :  { %v2403_v26 = vpop.f32.mrb[30].mxu1 }
0x16c7   :  { %v2404_v27 = vadd.f32 %v2700_v46, %v2403_v26  ;;  %v2933_v28 = vpop.f32.mrb[31].mxu1  ;;  %v2407_v29 = vadd.f32 %v2401_v32, %v2231_v54  ;;  %v2706_v54 = vld [vmem:[#allocation19 + $0x1] ss:$0 sm:$0xff] }
0x16c9   :  { %v2413_v30 = vsel %vm240_vm0, %v2407_v29, 0.0  ;;  %v2408_v9 = vadd.f32 %v2404_v27, %v2232_v55 }
0x16ca   :  { %2414 = vadd.xlane.f32.xlu0 %v2413_v30 }
0x16cb   :  { %v2416_v33 = vsel %vm240_vm0, %v2408_v9, 0.0 }
0x16cc   :  { %2417 = vadd.xlane.f32.xlu1 %v2416_v33 }
0x1757   :  { %v2415_v34 = vpop.xlane.xlu0 %2414 }
0x1758   :  { %v2419_v35 = vmul.f32 0.03125, %v2415_v34 }
0x1759   :  { %v2418_v52 = vpop.xlane.xlu1 %2417 }
0x175a   :  { %v2421_v53 = vsub.f32 %v2407_v29, %v2419_v35  ;;  %v2420_v36 = vmul.f32 0.03125, %v2418_v52 }
0x175c   :  { %v2422_v37 = vsub.f32 %v2408_v9, %v2420_v36  ;;  %v2423_v38 = vmul.f32 %v2421_v53, %v2421_v53 }
0x175e   :  { %v2425_v39 = vsel %vm240_vm0, %v2423_v38, 0.0  ;;  %v2424_v41 = vmul.f32 %v2422_v37, %v2422_v37 }
0x175f   :  { %2426 = vadd.xlane.f32.xlu0 %v2425_v39 }
0x1760   :  { %v2428_v42 = vsel %vm240_vm0, %v2424_v41, 0.0 }
0x1761   :  { %2429 = vadd.xlane.f32.xlu1 %v2428_v42 }
0x17ec   :  { %v2427_v45 = vpop.xlane.xlu0 %2426 }
0x17ed   :  { %v2431_v47 = vmul.f32 0.03125, %v2427_v45 }
0x17ee   :  { %v2430_v48 = vpop.xlane.xlu1 %2429 }
0x17ef   :  { %v2433_v49 = vadd.f32 1e-12, %v2431_v47  ;;  %v2432_v40 = vmul.f32 0.03125, %v2430_v48 }
0x17f1   :  { %3065 = vrsqrt.f32 %v2433_v49  ;;  %v2434_v50 = vadd.f32 1e-12, %v2432_v40 }
0x17f3   :  { %3067 = vrsqrt.f32 %v2434_v50 }
0x17fb   :  { %v3066_v51 = vpop.eup %3065 }
0x17fc   :  { %v2437_v55 = vmul.f32 %v3066_v51, %v2421_v53 }
0x17fd   :  { %v3068_v56 = vpop.eup %3067 }
0x17fe   :  { %v2445_v58 = vmul.f32 %v2706_v54, %v2437_v55  ;;  %v2438_v57 = vmul.f32 %v3068_v56, %v2422_v37 }
0x1800   :  { %v2446_v60 = vmul.f32 %v2706_v54, %v2438_v57  ;;  %v2453_v61 = vadd.f32 %v2707_v59, %v2445_v58 }
0x1802   :  { %v2454_v62 = vadd.f32 %v2707_v59, %v2446_v60 }
0x1804   :  { %v2455_v63 = vpack.c.bf16 %v2454_v62, %v2453_v61 }
0x1806   :  { %2939 = vmatmul.mubr.msk.bf16.vlgmr.msra.gmra.mrb[32].mxu0 %vm240_vm0, %v2455_v63 }
0x1807   :  { %2946 = vmatprep.mubr.msk.bf16.mxu0 %vm3415_vm1, %v3414_v15  ;;  %2943 = vmatpush3.bf16.msra.mxu0 %v3007_v0 }
0x1808   :  { %2944 = vmatprep.subr.bf16.mxu0 %v3414_v15 }
0x180b   :  { %2945 = vmatpush3.bf16.msra.mxu0 %v3008_v1 }
0x18d9   :  { %v2516_v4 = vpop.f32.mrb[32].mxu0 }
0x18da   :  { %v2517_v5 = vadd.f32 %v2708_v3, %v2516_v4  ;;  %v2940_v6 = vpop.f32.mrb[33].mxu0 }
0x18db   :  { %v2519_v7 = vpop.f32.mrb[34].mxu0 }
0x18dc   :  { %v2520_v8 = vadd.f32 %v2708_v3, %v2519_v7  ;;  %v2941_v10 = vpop.f32.mrb[35].mxu0  ;;  %3069 = vtanh.f32 %v2517_v5 }
0x18de   :  { %3071 = vtanh.f32 %v2520_v8 }
0x18e6   :  { %v3070_v11 = vpop.eup %3069 }
0x18e8   :  { %v3072_v12 = vpop.eup %3071 }
0x18e9   :  { %v2525_v13 = vpack.c.bf16 %v3072_v12, %v3070_v11 }
0x18eb   :  { %2947 = vmatmul.mubr.msk.bf16.vlgmr.msra.gmra.mrb[36].mxu0 %vm240_vm0, %v2525_v13 }
0x19be   :  { %v2586_v15 = vpop.f32.mrb[36].mxu0 }
0x19bf   :  { %v2587_v2 = vadd.f32 %v2712_v14, %v2586_v15  ;;  %v2948_v16 = vpop.f32.mrb[37].mxu0 }
0x19c0   :  { %v2589_v17 = vpop.f32.mrb[38].mxu0 }
0x19c1   :  { %2593 = vst [vmem:[#allocation23] sm:$0xff] %v2587_v2  ;;  %v2590_v18 = vadd.f32 %v2712_v14, %v2589_v17  ;;  %v2949_v19 = vpop.f32.mrb[39].mxu0 }
0x19c3   :  { %2594 = vst [vmem:[#allocation23 + $0x8] sm:$0xff] %v2590_v18 }
0x19c4   :  { %3370 = shalt.err (!%p3367_p10)
}
0x19c5   :  { %s3371_s11 = scalar_lea.hbm %s4085_s20, 256 }
0x19c6   :  { %p3372_p11 = scmp.ne.s32.totalorder %s4085_s20, %s3371_s11  ;;  %p3375_p12 = scmp.lt.u32.totalorder %s3371_s11, %s4085_s20 }
0x19c8   :  { %p3377_p13 = pnand %p3375_p12, %p3372_p11 }
0x19ca   :  { %3380 = shalt.err (!%p3377_p13)
}
0x19cb   :  { %2606 = dma.vmem_to_hbm [thread:$0]  %s2601_s5, 256, %s4085_s20, [#allocation4], %s3406_s15, %s3406_s15, %s3407_s1  }
0x19cc   :  { %3395 = dma.done.wait [#allocation4], 256  }
0x19cd   :  { %3396 = vsyncadd [#allocation4], 4294967040 }
0x19ce   :  { %2610 = vsyncpa [#allocation3], 1 }
0x19cf   :  { %2611 = vsyncpa [#allocation6], 1 }
0x19d0   :  { %2612 = vsyncpa [#allocation9], 1 }
0x19d1   :  { %2613 = vsyncpa [#allocation12], 1 }
0x19d2   :  { %2614 = vsyncpa [#allocation15], 1 }
0x19d3   :  { %2615 = vsyncpa [#allocation18], 1 }
0x19d4   :  { %2616 = vsyncpa [#allocation21], 1 }
0x19d5   :  { %2617 = vsyncpa [#allocation4], 1 }

</bundles_post_ra>
